<compile_context>
chip_gen: v6e
topology: v6e:2x2x1
jax: 0.10.0
libtpu: 0.0.40
codegen_flags: <defaults>
</compile_context>

<pallas_src>
import functools
import math

import jax
import jax.numpy as jnp
from jax import lax
from jax.experimental import pallas as pl
from jax.experimental.pallas import tpu as pltpu


def _split_channels(num_channels, num_groups, mode='equal'):
    if mode == 'exponential':
        split = [int(num_channels // math.pow(2, e + 1)) for e in range(num_groups)]
        split[-1] += num_channels - sum(split)
    elif mode == 'equal':
        split = [int(num_channels // num_groups) for _ in range(num_groups)]
        split[0] += num_channels - sum(split)
    else:
        return [num_channels]
    return split


def _act(x, nl):
    if nl == 'RE':
        return jnp.maximum(x, 0.0)
    elif nl == 'HS':  # Hswish: x * relu6(x + 3) / 6
        return x * jnp.clip(x + 3.0, 0.0, 6.0) * (1.0 / 6.0)
    raise NotImplementedError(nl)


# ---------------------------------------------------------------------------
# Fused kernel: one grid step == one image.
#   refs = (x, w1, b1, dw_0..dw_{G-1}, b2, [se_w1, se_w2], w2, b3,
#           out_ref, ybuf_scratch, zbuf_scratch)
# ---------------------------------------------------------------------------
def _fused_kernel(kernels, channels, H, W, ext, stride, se, use_res, nl,
                  ct_tile, st_tile, *refs):
    refs = list(refs)
    zbuf = refs.pop()            # VMEM scratch (exp, S)        f32  (DW output, bias folded)
    ybuf = refs.pop()            # VMEM scratch (exp, S+2*ext)  f32  (zero-extended act)
    o_ref = refs.pop()           # (1, oup, S)
    x_ref = refs.pop(0)          # (1, Cin, S) bf16
    w1_ref = refs.pop(0)         # (exp, Cin) bf16, BN1 scale folded
    b1_ref = refs.pop(0)         # (exp, 1) f32
    G = len(kernels)
    dw_refs = [refs.pop(0) for _ in range(G)]   # (ch_g, k_g*k_g) f32, BN2 scale folded
    b2_ref = refs.pop(0)         # (exp, 1) f32
    if se:
        sew1_ref = refs.pop(0)   # (red, exp) f32
        sew2_ref = refs.pop(0)   # (exp, red) f32
    w2_ref = refs.pop(0)         # (oup, exp) bf16, BN3 scale folded
    b3_ref = refs.pop(0)         # (oup, 1) f32
    assert not refs

    S = H * W
    exp_ch = sum(channels)
    p_max = max((k - 1) // 2 for k in kernels)

    # ---- stage 1: 1x1 conv (inp -> exp) + BN1 bias + act (bf16 MXU, f32 acc) ----
    xi = x_ref[0]                                                        # (Cin, S) bf16
    y1 = jnp.dot(w1_ref[...], xi, preferred_element_type=jnp.float32)    # (exp, S)
    y1 = _act(y1 + b1_ref[...], nl)

    # Zero-extended activation buffer: taps whose row falls outside the image land
    # in the halo (zeros); column wrap is killed with per-column masks below.
    # TODO(synk): zero the halo once per core (SMEM init flag) instead of per step;
    #             program_id(0)==0 gating would be unsafe under megacore sharding.
    ybuf[:, :ext] = jnp.zeros((exp_ch, ext), jnp.float32)
    ybuf[:, ext + S:] = jnp.zeros((exp_ch, ext), jnp.float32)
    ybuf[:, ext:ext + S] = y1

    # Per-column validity masks, one per horizontal offset, built in-kernel.
    col = lax.broadcasted_iota(jnp.int32, (1, S), 1) % W                 # (1, S)
    cmask = {oj: jnp.logical_and(col >= -oj, col < W - oj).astype(jnp.float32)
             for oj in range(-p_max, p_max + 1) if oj != 0}
    if se and stride > 1:
        row = lax.broadcasted_iota(jnp.int32, (1, S), 1) // W
        sel = jnp.logical_and(col % stride == 0, row % stride == 0).astype(jnp.float32)

    # ---- stage 2: mixed depthwise conv, register-tiled (ct_tile x st_tile) ----
    # TODO(synk): for W >= ~64 a row-padded (exp, H+2p, W_pad) layout would remove the
    #             column masks and the unaligned lane rotation of each patch load.
    pool_parts = []              # per-channel-tile SE pool partial sums (f32)
    off = 0
    for g, (k, ch) in enumerate(zip(kernels, channels)):
        p = (k - 1) // 2
        for ct in range(0, ch, ct_tile):
            cc = min(ct_tile, ch - ct)
            r0 = off + ct
            w_t = dw_refs[g][ct:ct + cc, :]                              # (cc, k*k)
            w_taps = [w_t[:, j:j + 1] for j in range(k * k)]             # hoisted
            b_t = b2_ref[r0:r0 + cc, :]                                  # (cc, 1)
            pool_t = jnp.zeros((cc, 1), jnp.float32) if se else None
            for st in range(0, S, st_tile):
                sw = min(st_tile, S - st)
                acc = jnp.zeros((cc, sw), jnp.float32)                   # stays in vregs
                for oj in range(-p, p + 1):
                    partial = None
                    for di in range(k):
                        d = (di - p) * W + oj
                        wv = w_taps[di * k + (oj + p)]                   # (cc, 1)
                        patch = ybuf[r0:r0 + cc, ext + st + d: ext + st + d + sw]
                        term = wv * patch
                        partial = term if partial is None else partial + term
                    if oj != 0:                                          # oj==0 always valid
                        partial = partial * cmask[oj][:, st:st + sw]
                    acc = acc + partial
                biased = acc + b_t                                       # BN2 bias folded
                if se:
                    if stride == 1:
                        pool_t = pool_t + jnp.sum(biased, axis=1, keepdims=True)
                    else:
                        # SE pool averages over strided output positions only.
                        pool_t = pool_t + jnp.sum(biased * sel[:, st:st + sw],
                                                  axis=1, keepdims=True)
                    zbuf[r0:r0 + cc, st:st + sw] = biased
                else:
                    zbuf[r0:r0 + cc, st:st + sw] = _act(biased, nl)      # act folded
            if se:
                pool_parts.append(pool_t)
        off += ch

    # ---- stage 3: SE + act + 1x1 conv (exp -> oup) + BN3 bias + residual ----
    if se:
        if stride == 1:
            n_pool = S
        else:
            n_pool = ((H + stride - 1) // stride) * ((W + stride - 1) // stride)
        m = jnp.concatenate(pool_parts, axis=0) * (1.0 / n_pool)         # (exp, 1) f32
        h = jnp.maximum(jnp.dot(sew1_ref[...], m,
                                preferred_element_type=jnp.float32), 0.0)
        gate = jnp.dot(sew2_ref[...], h, preferred_element_type=jnp.float32)
        gate = jnp.clip(gate + 3.0, 0.0, 6.0) * (1.0 / 6.0)              # Hsigmoid
        y2 = _act(zbuf[...] * gate, nl)
    else:
        y2 = zbuf[...]                                                   # act already folded
    z = jnp.dot(w2_ref[...], y2.astype(jnp.bfloat16),
                preferred_element_type=jnp.float32)                      # (oup, S)
    z = z + b3_ref[...]
    if use_res:
        z = z + x_ref[0].astype(jnp.float32)
    o_ref[0] = z


# ---------------------------------------------------------------------------
# Wrapper
# ---------------------------------------------------------------------------
def mobile_bottleneck_mixed(x, params, *, kernels, stride, se, nl):
    B, Cin, H, W = x.shape
    channels = params['channels']
    exp = sum(channels)
    oup = params['w2'].shape[0]
    use_res = (stride == 1 and Cin == oup)
    S = H * W
    G = len(kernels)
    assert all(k % 2 == 1 for k in kernels), "odd kernels expected (MixNet)"

    pad_max = max((k - 1) // 2 for k in kernels)
    D = pad_max * W + pad_max                    # max |flattened tap offset|
    ext = ((D + 127) // 128) * 128               # lane-aligned zero extension width

    # register-tile sizes for the depthwise accumulator
    ct_tile = 8                                  # sublane tile (channels)
    st_tile = min(S, 512)                        # lane tile (spatial); ragged last tile ok

    # ---- host-side weight prep: fold BN scales, cast MXU operands to bf16 ----
    w1f = (params['w1'] * params['bn1_scale']).astype(jnp.bfloat16)       # (exp, Cin)
    b1 = params['bn1_bias']
    dwf, off = [], 0
    for g, (k, ch) in enumerate(zip(kernels, channels)):
        wg = params['dw'][g].reshape(ch, k * k)                           # (ch, kk)
        dwf.append((wg * params['bn2_scale'][off:off + ch]).astype(jnp.float32))
        off += ch
    b2 = params['bn2_bias']
    w2f = (params['w2'] * params['bn3_scale']).astype(jnp.bfloat16)       # (oup, exp)
    b3 = params['bn3_bias']

    # input pre-cast to bf16 (halves input DMA); residual re-cast in-kernel
    x_flat = x.reshape(B, Cin, S).astype(jnp.bfloat16)

    ins = [x_flat, w1f, b1] + dwf + [b2]
    specs = [
        pl.BlockSpec((1, Cin, S), lambda b: (b, 0, 0)),
        pl.BlockSpec((exp, Cin), lambda b: (0, 0)),
        pl.BlockSpec((exp, 1), lambda b: (0, 0)),
    ]
    specs += [pl.BlockSpec((channels[g], kernels[g] * kernels[g]), lambda b: (0, 0))
              for g in range(G)]
    specs += [pl.BlockSpec((exp, 1), lambda b: (0, 0))]
    se_bytes = 0
    if se:
        red = params['se_w1'].shape[0]
        # SE mat-vecs are tiny -> keep in f32 (avoids gate drift for large exp)
        ins += [params['se_w1'].astype(jnp.float32),
                params['se_w2'].astype(jnp.float32)]
        specs += [pl.BlockSpec((red, exp), lambda b: (0, 0)),
                  pl.BlockSpec((exp, red), lambda b: (0, 0))]
        se_bytes = 2 * red * exp * 4
    ins += [w2f, b3]
    specs += [pl.BlockSpec((oup, exp), lambda b: (0, 0)),
              pl.BlockSpec((oup, 1), lambda b: (0, 0))]

    # explicit VMEM budget: scratch + double-buffered per-image I/O blocks + weights
    scratch_bytes = exp * (S + 2 * ext) * 4 + exp * S * 4
    io_bytes = 2 * Cin * S * 2 + 2 * oup * S * 4
    w_bytes = (exp * Cin + oup * exp) * 2 + (2 * exp + oup) * 4 + se_bytes + \
              sum(channels[g] * kernels[g] ** 2 * 4 for g in range(G))
    vmem_limit = min(max(int(1.5 * (scratch_bytes + io_bytes + 2 * w_bytes)) + (4 << 20),
                         32 << 20), 112 << 20)

    out = pl.pallas_call(
        functools.partial(_fused_kernel, tuple(kernels), tuple(channels),
                          H, W, ext, stride, se, use_res, nl, ct_tile, st_tile),
        grid=(B,),
        in_specs=specs,
        out_specs=pl.BlockSpec((1, oup, S), lambda b: (b, 0, 0)),
        out_shape=jax.ShapeDtypeStruct((B, oup, S), jnp.float32),
        scratch_shapes=[pltpu.VMEM((exp, S + 2 * ext), jnp.float32),
                        pltpu.VMEM((exp, S), jnp.float32)],
        compiler_params=pltpu.CompilerParams(
            dimension_semantics=("parallel",),
            vmem_limit_bytes=vmem_limit),
    )(*ins)

    out = out.reshape(B, oup, H, W)
    if stride > 1:
        # TODO(synk): emit only strided output positions in-kernel (S_out block) to cut
        #             stage-3 MXU work and writeback by stride^2; dense + host slice kept.
        out = out[:, :, ::stride, ::stride]
    return out


# ---------------------------------------------------------------------------
# Deterministic parameter init (synthetic; no checkpoint loading).
# TODO(synk): BatchNorm training-mode batch-statistics update is not modeled;
#             BN is applied in inference mode as a folded affine.
# ---------------------------------------------------------------------------
def _fold_bn(gamma, beta, mean, var, eps=1e-5):
    scale = gamma / jnp.sqrt(var + eps)
    bias = beta - mean * scale
    return scale.reshape(-1, 1), bias.reshape(-1, 1)


def init_params(key, inp, oup, kernels, exp, se):
    groups = len(kernels)
    channels = _split_channels(exp, groups)
    keys = iter(jax.random.split(key, 32))
    nk = lambda: next(keys)

    def bn(c):
        gamma = jax.random.uniform(nk(), (c,), jnp.float32, 0.8, 1.2)
        beta = jax.random.normal(nk(), (c,), jnp.float32) * 0.1
        mean = jax.random.normal(nk(), (c,), jnp.float32) * 0.1
        var = jax.random.uniform(nk(), (c,), jnp.float32, 0.5, 1.5)
        return _fold_bn(gamma, beta, mean, var)

    params = {'channels': channels}
    params['w1'] = jax.random.normal(nk(), (exp, inp), jnp.float32) * 0.3
    params['bn1_scale'], params['bn1_bias'] = bn(exp)
    params['dw'] = [jax.random.normal(nk(), (channels[g], kernels[g], kernels[g]),
                                      jnp.float32) * 0.2 for g in range(groups)]
    params['bn2_scale'], params['bn2_bias'] = bn(exp)
    if se:
        red = exp // 4
        params['se_w1'] = jax.random.normal(nk(), (red, exp), jnp.float32) * 0.3
        params['se_w2'] = jax.random.normal(nk(), (exp, red), jnp.float32) * 0.3
    params['w2'] = jax.random.normal(nk(), (oup, exp), jnp.float32) * 0.3
    params['bn3_scale'], params['bn3_bias'] = bn(oup)
    return params


# ---------------------------------------------------------------------------
# Pure-JAX f32 reference (for correctness check)
# ---------------------------------------------------------------------------
def reference(x, params, *, kernels, stride, se, nl):
    channels = params['channels']
    B, Cin, H, W = x.shape
    y = jnp.einsum('oc,bchw->bohw', params['w1'], x)
    y = y * params['bn1_scale'].reshape(1, -1, 1, 1) + params['bn1_bias'].reshape(1, -1, 1, 1)
    y = _act(y, nl)
    outs, off = [], 0
    for g, (k, ch) in enumerate(zip(kernels, channels)):
        p = (k - 1) // 2
        yg = y[:, off:off + ch]
        wg = params['dw'][g].reshape(ch, 1, k, k)
        og = lax.conv_general_dilated(
            yg, wg, window_strides=(stride, stride), padding=[(p, p), (p, p)],
            dimension_numbers=('NCHW', 'OIHW', 'NCHW'), feature_group_count=ch)
        outs.append(og)
        off += ch
    y = jnp.concatenate(outs, axis=1)
    y = y * params['bn2_scale'].reshape(1, -1, 1, 1) + params['bn2_bias'].reshape(1, -1, 1, 1)
    if se:
        m = jnp.mean(y, axis=(2, 3))
        h = jnp.maximum(m @ params['se_w1'].T, 0.0)
        gate = jnp.clip(h @ params['se_w2'].T + 3.0, 0.0, 6.0) / 6.0
        y = y * gate[:, :, None, None]
    y = _act(y, nl)
    z = jnp.einsum('oc,bchw->bohw', params['w2'], y)
    z = z * params['bn3_scale'].reshape(1, -1, 1, 1) + params['bn3_bias'].reshape(1, -1, 1, 1)
    if stride == 1 and Cin == params['w2'].shape[0]:
        z = z + x
    return z


if __name__ == "__main__":
    B, inp, H, W = 2, 4, 16, 16
    oup, exp = 4, 8
    kernels = [3, 5]
    stride = 1
    se = True
    nl = 'HS'

    key = jax.random.PRNGKey(0)
    kx, kp = jax.random.split(key)
    x = jax.random.normal(kx, (B, inp, H, W), jnp.float32)
    params = init_params(kp, inp, oup, kernels, exp, se)

    out = mobile_bottleneck_mixed(x, params, kernels=kernels, stride=stride, se=se, nl=nl)
    out = jax.block_until_ready(out)

    ref = reference(x, params, kernels=kernels, stride=stride, se=se, nl=nl)
    assert out.shape == ref.shape, (out.shape, ref.shape)
    err = float(jnp.max(jnp.abs(out - ref)))
    # Kernel feeds bf16 operands to the MXU and a bf16 input/residual; reference is f32.
    tol = 2e-2 * float(jnp.max(jnp.abs(ref))) + 2e-2
    assert err < tol, f"max abs err {err} (tol {tol})"
    print("KERNEL_OK")
</pallas_src>

<mosaic_0001>
module attributes {stable_mosaic.version = 11 : i64} {
  func.func @_fused_kernel(%arg0: i32, %arg1: memref<1x4x256xbf16, #tpu.memory_space<vmem>>, %arg2: memref<8x4xbf16, #tpu.memory_space<vmem>>, %arg3: memref<8x1xf32, #tpu.memory_space<vmem>>, %arg4: memref<4x9xf32, #tpu.memory_space<vmem>>, %arg5: memref<4x25xf32, #tpu.memory_space<vmem>>, %arg6: memref<8x1xf32, #tpu.memory_space<vmem>>, %arg7: memref<2x8xf32, #tpu.memory_space<vmem>>, %arg8: memref<8x2xf32, #tpu.memory_space<vmem>>, %arg9: memref<4x8xbf16, #tpu.memory_space<vmem>>, %arg10: memref<4x1xf32, #tpu.memory_space<vmem>>, %arg11: memref<1x4x256xf32, #tpu.memory_space<vmem>>, %arg12: memref<8x512xf32, #tpu.memory_space<vmem>>, %arg13: memref<8x256xf32, #tpu.memory_space<vmem>>) attributes {dimension_semantics = [#tpu.dimension_semantics<parallel>], iteration_bounds = array<i64: 2>, scalar_prefetch = 0 : i64, scratch_operands = 2 : i64, tpu.core_type = #tpu.core_type<tc>, window_params = [{transform_indices = @transform_0, window_bounds = array<i64: 1, 4, 256>}, {pipeline_mode = #tpu.pipeline_mode<synchronous>, transform_indices = @transform_1, window_bounds = array<i64: 8, 4>}, {pipeline_mode = #tpu.pipeline_mode<synchronous>, transform_indices = @transform_2, window_bounds = array<i64: 8, 1>}, {pipeline_mode = #tpu.pipeline_mode<synchronous>, transform_indices = @transform_3, window_bounds = array<i64: 4, 9>}, {pipeline_mode = #tpu.pipeline_mode<synchronous>, transform_indices = @transform_4, window_bounds = array<i64: 4, 25>}, {pipeline_mode = #tpu.pipeline_mode<synchronous>, transform_indices = @transform_5, window_bounds = array<i64: 8, 1>}, {pipeline_mode = #tpu.pipeline_mode<synchronous>, transform_indices = @transform_6, window_bounds = array<i64: 2, 8>}, {pipeline_mode = #tpu.pipeline_mode<synchronous>, transform_indices = @transform_7, window_bounds = array<i64: 8, 2>}, {pipeline_mode = #tpu.pipeline_mode<synchronous>, transform_indices = @transform_8, window_bounds = array<i64: 4, 8>}, {pipeline_mode = #tpu.pipeline_mode<synchronous>, transform_indices = @transform_9, window_bounds = array<i64: 4, 1>}, {transform_indices = @transform_10, window_bounds = array<i64: 1, 4, 256>}]} {
    %c0 = arith.constant 0 : index
    %c0_0 = arith.constant 0 : index
    %c0_1 = arith.constant 0 : index
    %0 = vector.load %arg1[%c0, %c0_0, %c0_1] : memref<1x4x256xbf16, #tpu.memory_space<vmem>>, vector<1x4x256xbf16>
    %1 = vector.shape_cast %0 : vector<1x4x256xbf16> to vector<4x256xbf16>
    %c0_2 = arith.constant 0 : index
    %c0_3 = arith.constant 0 : index
    %2 = vector.load %arg2[%c0_2, %c0_3] : memref<8x4xbf16, #tpu.memory_space<vmem>>, vector<8x4xbf16>
    %cst = arith.constant dense<0.000000e+00> : vector<8x256xf32>
    %3 = tpu.matmul %2, %1, %cst {dimension_numbers = #tpu.dot_dimension_numbers<[1], [0], [0], [1], [0, 0, 1, 1], [], []>} : vector<8x4xbf16>, vector<4x256xbf16>, vector<8x256xf32> -> vector<8x256xf32>
    %c0_4 = arith.constant 0 : index
    %c0_5 = arith.constant 0 : index
    %4 = vector.load %arg3[%c0_4, %c0_5] : memref<8x1xf32, #tpu.memory_space<vmem>>, vector<8x1xf32>
    %5 = vector.broadcast %4 : vector<8x1xf32> to vector<8x256xf32>
    %6 = arith.addf %3, %5 : vector<8x256xf32>
    %cst_6 = arith.constant 3.000000e+00 : f32
    %7 = vector.broadcast %cst_6 : f32 to vector<8x256xf32>
    %8 = arith.addf %6, %7 : vector<8x256xf32>
    %cst_7 = arith.constant 0.000000e+00 : f32
    %cst_8 = arith.constant 6.000000e+00 : f32
    %9 = vector.broadcast %cst_7 : f32 to vector<8x256xf32>
    %10 = arith.maximumf %9, %8 : vector<8x256xf32>
    %11 = vector.broadcast %cst_8 : f32 to vector<8x256xf32>
    %12 = arith.minimumf %11, %10 : vector<8x256xf32>
    %13 = arith.mulf %6, %12 : vector<8x256xf32>
    %cst_9 = arith.constant 0.166666672 : f32
    %14 = vector.broadcast %cst_9 : f32 to vector<8x256xf32>
    %15 = arith.mulf %13, %14 : vector<8x256xf32>
    %cst_10 = arith.constant 0.000000e+00 : f32
    %16 = vector.broadcast %cst_10 : f32 to vector<8x128xf32>
    %c0_11 = arith.constant 0 : index
    %c0_12 = arith.constant 0 : index
    %17 = vector.load %arg12[%c0_11, %c0_12] : memref<8x512xf32, #tpu.memory_space<vmem>>, vector<8x128xf32>
    tpu.vector_store %arg12[%c0_11, %c0_12], %16 {strides = array<i32>} : memref<8x512xf32, #tpu.memory_space<vmem>>, vector<8x128xf32>,
    %cst_13 = arith.constant 0.000000e+00 : f32
    %18 = vector.broadcast %cst_13 : f32 to vector<8x128xf32>
    %c0_14 = arith.constant 0 : index
    %c384 = arith.constant 384 : index
    %19 = vector.load %arg12[%c0_14, %c384] : memref<8x512xf32, #tpu.memory_space<vmem>>, vector<8x128xf32>
    tpu.vector_store %arg12[%c0_14, %c384], %18 {strides = array<i32>} : memref<8x512xf32, #tpu.memory_space<vmem>>, vector<8x128xf32>,
    %c0_15 = arith.constant 0 : index
    %c128 = arith.constant 128 : index
    %20 = vector.load %arg12[%c0_15, %c128] : memref<8x512xf32, #tpu.memory_space<vmem>>, vector<8x256xf32>
    tpu.vector_store %arg12[%c0_15, %c128], %15 {strides = array<i32>} : memref<8x512xf32, #tpu.memory_space<vmem>>, vector<8x256xf32>,
    %21 = tpu.iota {dimensions = array<i32: 1>} : vector<1x256xi32>
    %c16_i32 = arith.constant 16 : i32
    %c0_i32 = arith.constant 0 : i32
    %22 = arith.cmpi eq, %c16_i32, %c0_i32 : i32
    %c1_i32 = arith.constant 1 : i32
    %23 = arith.select %22, %c1_i32, %c16_i32 : i32
    %24 = vector.broadcast %23 : i32 to vector<1x256xi32>
    %25 = arith.remsi %21, %24 : vector<1x256xi32>
    %c0_i32_16 = arith.constant 0 : i32
    %26 = vector.broadcast %c0_i32_16 : i32 to vector<1x256xi32>
    %27 = arith.cmpi ne, %25, %26 : vector<1x256xi32>
    %c0_i32_17 = arith.constant 0 : i32
    %28 = vector.broadcast %c0_i32_17 : i32 to vector<1x256xi32>
    %29 = arith.cmpi slt, %25, %28 : vector<1x256xi32>
    %c0_i32_18 = arith.constant 0 : i32
    %30 = arith.cmpi slt, %23, %c0_i32_18 : i32
    %31 = vector.broadcast %30 : i1 to vector<1x256xi1>
    %32 = vector.broadcast %31 : vector<1x256xi1> to vector<1x256xi1>
    %33 = arith.xori %29, %32 : vector<1x256xi1>
    %34 = arith.andi %33, %27 : vector<1x256xi1>
    %35 = vector.broadcast %23 : i32 to vector<1x256xi32>
    %36 = arith.addi %25, %35 : vector<1x256xi32>
    %37 = arith.select %34, %36, %25 : vector<1x256xi1>, vector<1x256xi32>
    %c2_i32 = arith.constant 2 : i32
    %38 = vector.broadcast %c2_i32 : i32 to vector<1x256xi32>
    %39 = arith.cmpi sge, %37, %38 : vector<1x256xi32>
    %c18_i32 = arith.constant 18 : i32
    %40 = vector.broadcast %c18_i32 : i32 to vector<1x256xi32>
    %41 = arith.cmpi slt, %37, %40 : vector<1x256xi32>
    %42 = arith.andi %39, %41 : vector<1x256xi1>
    %43 = arith.extui %42 : vector<1x256xi1> to vector<1x256xi32>
    %44 = arith.sitofp %43 : vector<1x256xi32> to vector<1x256xf32>
    %c1_i32_19 = arith.constant 1 : i32
    %45 = vector.broadcast %c1_i32_19 : i32 to vector<1x256xi32>
    %46 = arith.cmpi sge, %37, %45 : vector<1x256xi32>
    %c17_i32 = arith.constant 17 : i32
    %47 = vector.broadcast %c17_i32 : i32 to vector<1x256xi32>
    %48 = arith.cmpi slt, %37, %47 : vector<1x256xi32>
    %49 = arith.andi %46, %48 : vector<1x256xi1>
    %50 = arith.extui %49 : vector<1x256xi1> to vector<1x256xi32>
    %51 = arith.sitofp %50 : vector<1x256xi32> to vector<1x256xf32>
    %c-1_i32 = arith.constant -1 : i32
    %52 = vector.broadcast %c-1_i32 : i32 to vector<1x256xi32>
    %53 = arith.cmpi sge, %37, %52 : vector<1x256xi32>
    %c15_i32 = arith.constant 15 : i32
    %54 = vector.broadcast %c15_i32 : i32 to vector<1x256xi32>
    %55 = arith.cmpi slt, %37, %54 : vector<1x256xi32>
    %56 = arith.andi %53, %55 : vector<1x256xi1>
    %57 = arith.extui %56 : vector<1x256xi1> to vector<1x256xi32>
    %58 = arith.sitofp %57 : vector<1x256xi32> to vector<1x256xf32>
    %c-2_i32 = arith.constant -2 : i32
    %59 = vector.broadcast %c-2_i32 : i32 to vector<1x256xi32>
    %60 = arith.cmpi sge, %37, %59 : vector<1x256xi32>
    %c14_i32 = arith.constant 14 : i32
    %61 = vector.broadcast %c14_i32 : i32 to vector<1x256xi32>
    %62 = arith.cmpi slt, %37, %61 : vector<1x256xi32>
    %63 = arith.andi %60, %62 : vector<1x256xi1>
    %64 = arith.extui %63 : vector<1x256xi1> to vector<1x256xi32>
    %65 = arith.sitofp %64 : vector<1x256xi32> to vector<1x256xf32>
    %c0_20 = arith.constant 0 : index
    %c0_21 = arith.constant 0 : index
    %66 = vector.load %arg4[%c0_20, %c0_21] : memref<4x9xf32, #tpu.memory_space<vmem>>, vector<4x9xf32>
    %67 = vector.extract_strided_slice %66 {offsets = [0, 0], sizes = [4, 1], strides = [1, 1]} : vector<4x9xf32> to vector<4x1xf32>
    %68 = vector.extract_strided_slice %66 {offsets = [0, 1], sizes = [4, 1], strides = [1, 1]} : vector<4x9xf32> to vector<4x1xf32>
    %69 = vector.extract_strided_slice %66 {offsets = [0, 2], sizes = [4, 1], strides = [1, 1]} : vector<4x9xf32> to vector<4x1xf32>
    %70 = vector.extract_strided_slice %66 {offsets = [0, 3], sizes = [4, 1], strides = [1, 1]} : vector<4x9xf32> to vector<4x1xf32>
    %71 = vector.extract_strided_slice %66 {offsets = [0, 4], sizes = [4, 1], strides = [1, 1]} : vector<4x9xf32> to vector<4x1xf32>
    %72 = vector.extract_strided_slice %66 {offsets = [0, 5], sizes = [4, 1], strides = [1, 1]} : vector<4x9xf32> to vector<4x1xf32>
    %73 = vector.extract_strided_slice %66 {offsets = [0, 6], sizes = [4, 1], strides = [1, 1]} : vector<4x9xf32> to vector<4x1xf32>
    %74 = vector.extract_strided_slice %66 {offsets = [0, 7], sizes = [4, 1], strides = [1, 1]} : vector<4x9xf32> to vector<4x1xf32>
    %75 = vector.extract_strided_slice %66 {offsets = [0, 8], sizes = [4, 1], strides = [1, 1]} : vector<4x9xf32> to vector<4x1xf32>
    %c0_22 = arith.constant 0 : index
    %c0_23 = arith.constant 0 : index
    %76 = vector.load %arg6[%c0_22, %c0_23] : memref<8x1xf32, #tpu.memory_space<vmem>>, vector<4x1xf32>
    %cst_24 = arith.constant 0.000000e+00 : f32
    %77 = vector.broadcast %cst_24 : f32 to vector<4x1xf32>
    %cst_25 = arith.constant 0.000000e+00 : f32
    %78 = vector.broadcast %cst_25 : f32 to vector<4x256xf32>
    %c0_26 = arith.constant 0 : index
    %c111 = arith.constant 111 : index
    %79 = vector.load %arg12[%c0_26, %c111] : memref<8x512xf32, #tpu.memory_space<vmem>>, vector<4x256xf32>
    %80 = vector.broadcast %67 : vector<4x1xf32> to vector<4x256xf32>
    %81 = arith.mulf %80, %79 : vector<4x256xf32>
    %c0_27 = arith.constant 0 : index
    %c127 = arith.constant 127 : index
    %82 = vector.load %arg12[%c0_27, %c127] : memref<8x512xf32, #tpu.memory_space<vmem>>, vector<4x256xf32>
    %83 = vector.broadcast %70 : vector<4x1xf32> to vector<4x256xf32>
    %84 = arith.mulf %83, %82 : vector<4x256xf32>
    %85 = arith.addf %81, %84 : vector<4x256xf32>
    %c0_28 = arith.constant 0 : index
    %c143 = arith.constant 143 : index
    %86 = vector.load %arg12[%c0_28, %c143] : memref<8x512xf32, #tpu.memory_space<vmem>>, vector<4x256xf32>
    %87 = vector.broadcast %73 : vector<4x1xf32> to vector<4x256xf32>
    %88 = arith.mulf %87, %86 : vector<4x256xf32>
    %89 = arith.addf %85, %88 : vector<4x256xf32>
    %90 = vector.broadcast %51 : vector<1x256xf32> to vector<4x256xf32>
    %91 = arith.mulf %89, %90 : vector<4x256xf32>
    %92 = arith.addf %78, %91 : vector<4x256xf32>
    %c0_29 = arith.constant 0 : index
    %c112 = arith.constant 112 : index
    %93 = vector.load %arg12[%c0_29, %c112] : memref<8x512xf32, #tpu.memory_space<vmem>>, vector<4x256xf32>
    %94 = vector.broadcast %68 : vector<4x1xf32> to vector<4x256xf32>
    %95 = arith.mulf %94, %93 : vector<4x256xf32>
    %c0_30 = arith.constant 0 : index
    %c128_31 = arith.constant 128 : index
    %96 = vector.load %arg12[%c0_30, %c128_31] : memref<8x512xf32, #tpu.memory_space<vmem>>, vector<4x256xf32>
    %97 = vector.broadcast %71 : vector<4x1xf32> to vector<4x256xf32>
    %98 = arith.mulf %97, %96 : vector<4x256xf32>
    %99 = arith.addf %95, %98 : vector<4x256xf32>
    %c0_32 = arith.constant 0 : index
    %c144 = arith.constant 144 : index
    %100 = vector.load %arg12[%c0_32, %c144] : memref<8x512xf32, #tpu.memory_space<vmem>>, vector<4x256xf32>
    %101 = vector.broadcast %74 : vector<4x1xf32> to vector<4x256xf32>
    %102 = arith.mulf %101, %100 : vector<4x256xf32>
    %103 = arith.addf %99, %102 : vector<4x256xf32>
    %104 = arith.addf %92, %103 : vector<4x256xf32>
    %c0_33 = arith.constant 0 : index
    %c113 = arith.constant 113 : index
    %105 = vector.load %arg12[%c0_33, %c113] : memref<8x512xf32, #tpu.memory_space<vmem>>, vector<4x256xf32>
    %106 = vector.broadcast %69 : vector<4x1xf32> to vector<4x256xf32>
    %107 = arith.mulf %106, %105 : vector<4x256xf32>
    %c0_34 = arith.constant 0 : index
    %c129 = arith.constant 129 : index
    %108 = vector.load %arg12[%c0_34, %c129] : memref<8x512xf32, #tpu.memory_space<vmem>>, vector<4x256xf32>
    %109 = vector.broadcast %72 : vector<4x1xf32> to vector<4x256xf32>
    %110 = arith.mulf %109, %108 : vector<4x256xf32>
    %111 = arith.addf %107, %110 : vector<4x256xf32>
    %c0_35 = arith.constant 0 : index
    %c145 = arith.constant 145 : index
    %112 = vector.load %arg12[%c0_35, %c145] : memref<8x512xf32, #tpu.memory_space<vmem>>, vector<4x256xf32>
    %113 = vector.broadcast %75 : vector<4x1xf32> to vector<4x256xf32>
    %114 = arith.mulf %113, %112 : vector<4x256xf32>
    %115 = arith.addf %111, %114 : vector<4x256xf32>
    %116 = vector.broadcast %58 : vector<1x256xf32> to vector<4x256xf32>
    %117 = arith.mulf %115, %116 : vector<4x256xf32>
    %118 = arith.addf %104, %117 : vector<4x256xf32>
    %119 = vector.broadcast %76 : vector<4x1xf32> to vector<4x256xf32>
    %120 = arith.addf %118, %119 : vector<4x256xf32>
    %cst_36 = arith.constant dense<0.000000e+00> : vector<4xf32>
    %121 = vector.multi_reduction <add>, %120, %cst_36 [1] : vector<4x256xf32> to vector<4xf32>
    %122 = vector.shape_cast %121 : vector<4xf32> to vector<4x1xf32>
    %123 = arith.addf %77, %122 : vector<4x1xf32>
    %c0_37 = arith.constant 0 : index
    %c0_38 = arith.constant 0 : index
    %124 = vector.load %arg13[%c0_37, %c0_38] : memref<8x256xf32, #tpu.memory_space<vmem>>, vector<4x256xf32>
    tpu.vector_store %arg13[%c0_37, %c0_38], %120 {strides = array<i32>} : memref<8x256xf32, #tpu.memory_space<vmem>>, vector<4x256xf32>,
    %c0_39 = arith.constant 0 : index
    %c0_40 = arith.constant 0 : index
    %125 = vector.load %arg5[%c0_39, %c0_40] : memref<4x25xf32, #tpu.memory_space<vmem>>, vector<4x25xf32>
    %126 = vector.extract_strided_slice %125 {offsets = [0, 0], sizes = [4, 1], strides = [1, 1]} : vector<4x25xf32> to vector<4x1xf32>
    %127 = vector.extract_strided_slice %125 {offsets = [0, 1], sizes = [4, 1], strides = [1, 1]} : vector<4x25xf32> to vector<4x1xf32>
    %128 = vector.extract_strided_slice %125 {offsets = [0, 2], sizes = [4, 1], strides = [1, 1]} : vector<4x25xf32> to vector<4x1xf32>
    %129 = vector.extract_strided_slice %125 {offsets = [0, 3], sizes = [4, 1], strides = [1, 1]} : vector<4x25xf32> to vector<4x1xf32>
    %130 = vector.extract_strided_slice %125 {offsets = [0, 4], sizes = [4, 1], strides = [1, 1]} : vector<4x25xf32> to vector<4x1xf32>
    %131 = vector.extract_strided_slice %125 {offsets = [0, 5], sizes = [4, 1], strides = [1, 1]} : vector<4x25xf32> to vector<4x1xf32>
    %132 = vector.extract_strided_slice %125 {offsets = [0, 6], sizes = [4, 1], strides = [1, 1]} : vector<4x25xf32> to vector<4x1xf32>
    %133 = vector.extract_strided_slice %125 {offsets = [0, 7], sizes = [4, 1], strides = [1, 1]} : vector<4x25xf32> to vector<4x1xf32>
    %134 = vector.extract_strided_slice %125 {offsets = [0, 8], sizes = [4, 1], strides = [1, 1]} : vector<4x25xf32> to vector<4x1xf32>
    %135 = vector.extract_strided_slice %125 {offsets = [0, 9], sizes = [4, 1], strides = [1, 1]} : vector<4x25xf32> to vector<4x1xf32>
    %136 = vector.extract_strided_slice %125 {offsets = [0, 10], sizes = [4, 1], strides = [1, 1]} : vector<4x25xf32> to vector<4x1xf32>
    %137 = vector.extract_strided_slice %125 {offsets = [0, 11], sizes = [4, 1], strides = [1, 1]} : vector<4x25xf32> to vector<4x1xf32>
    %138 = vector.extract_strided_slice %125 {offsets = [0, 12], sizes = [4, 1], strides = [1, 1]} : vector<4x25xf32> to vector<4x1xf32>
    %139 = vector.extract_strided_slice %125 {offsets = [0, 13], sizes = [4, 1], strides = [1, 1]} : vector<4x25xf32> to vector<4x1xf32>
    %140 = vector.extract_strided_slice %125 {offsets = [0, 14], sizes = [4, 1], strides = [1, 1]} : vector<4x25xf32> to vector<4x1xf32>
    %141 = vector.extract_strided_slice %125 {offsets = [0, 15], sizes = [4, 1], strides = [1, 1]} : vector<4x25xf32> to vector<4x1xf32>
    %142 = vector.extract_strided_slice %125 {offsets = [0, 16], sizes = [4, 1], strides = [1, 1]} : vector<4x25xf32> to vector<4x1xf32>
    %143 = vector.extract_strided_slice %125 {offsets = [0, 17], sizes = [4, 1], strides = [1, 1]} : vector<4x25xf32> to vector<4x1xf32>
    %144 = vector.extract_strided_slice %125 {offsets = [0, 18], sizes = [4, 1], strides = [1, 1]} : vector<4x25xf32> to vector<4x1xf32>
    %145 = vector.extract_strided_slice %125 {offsets = [0, 19], sizes = [4, 1], strides = [1, 1]} : vector<4x25xf32> to vector<4x1xf32>
    %146 = vector.extract_strided_slice %125 {offsets = [0, 20], sizes = [4, 1], strides = [1, 1]} : vector<4x25xf32> to vector<4x1xf32>
    %147 = vector.extract_strided_slice %125 {offsets = [0, 21], sizes = [4, 1], strides = [1, 1]} : vector<4x25xf32> to vector<4x1xf32>
    %148 = vector.extract_strided_slice %125 {offsets = [0, 22], sizes = [4, 1], strides = [1, 1]} : vector<4x25xf32> to vector<4x1xf32>
    %149 = vector.extract_strided_slice %125 {offsets = [0, 23], sizes = [4, 1], strides = [1, 1]} : vector<4x25xf32> to vector<4x1xf32>
    %150 = vector.extract_strided_slice %125 {offsets = [0, 24], sizes = [4, 1], strides = [1, 1]} : vector<4x25xf32> to vector<4x1xf32>
    %c4 = arith.constant 4 : index
    %c0_41 = arith.constant 0 : index
    %151 = vector.load %arg6[%c4, %c0_41] : memref<8x1xf32, #tpu.memory_space<vmem>>, vector<4x1xf32>
    %cst_42 = arith.constant 0.000000e+00 : f32
    %152 = vector.broadcast %cst_42 : f32 to vector<4x1xf32>
    %cst_43 = arith.constant 0.000000e+00 : f32
    %153 = vector.broadcast %cst_43 : f32 to vector<4x256xf32>
    %c4_44 = arith.constant 4 : index
    %c94 = arith.constant 94 : index
    %154 = vector.load %arg12[%c4_44, %c94] : memref<8x512xf32, #tpu.memory_space<vmem>>, vector<4x256xf32>
    %155 = vector.broadcast %126 : vector<4x1xf32> to vector<4x256xf32>
    %156 = arith.mulf %155, %154 : vector<4x256xf32>
    %c4_45 = arith.constant 4 : index
    %c110 = arith.constant 110 : index
    %157 = vector.load %arg12[%c4_45, %c110] : memref<8x512xf32, #tpu.memory_space<vmem>>, vector<4x256xf32>
    %158 = vector.broadcast %131 : vector<4x1xf32> to vector<4x256xf32>
    %159 = arith.mulf %158, %157 : vector<4x256xf32>
    %160 = arith.addf %156, %159 : vector<4x256xf32>
    %c4_46 = arith.constant 4 : index
    %c126 = arith.constant 126 : index
    %161 = vector.load %arg12[%c4_46, %c126] : memref<8x512xf32, #tpu.memory_space<vmem>>, vector<4x256xf32>
    %162 = vector.broadcast %136 : vector<4x1xf32> to vector<4x256xf32>
    %163 = arith.mulf %162, %161 : vector<4x256xf32>
    %164 = arith.addf %160, %163 : vector<4x256xf32>
    %c4_47 = arith.constant 4 : index
    %c142 = arith.constant 142 : index
    %165 = vector.load %arg12[%c4_47, %c142] : memref<8x512xf32, #tpu.memory_space<vmem>>, vector<4x256xf32>
    %166 = vector.broadcast %141 : vector<4x1xf32> to vector<4x256xf32>
    %167 = arith.mulf %166, %165 : vector<4x256xf32>
    %168 = arith.addf %164, %167 : vector<4x256xf32>
    %c4_48 = arith.constant 4 : index
    %c158 = arith.constant 158 : index
    %169 = vector.load %arg12[%c4_48, %c158] : memref<8x512xf32, #tpu.memory_space<vmem>>, vector<4x256xf32>
    %170 = vector.broadcast %146 : vector<4x1xf32> to vector<4x256xf32>
    %171 = arith.mulf %170, %169 : vector<4x256xf32>
    %172 = arith.addf %168, %171 : vector<4x256xf32>
    %173 = vector.broadcast %44 : vector<1x256xf32> to vector<4x256xf32>
    %174 = arith.mulf %172, %173 : vector<4x256xf32>
    %175 = arith.addf %153, %174 : vector<4x256xf32>
    %c4_49 = arith.constant 4 : index
    %c95 = arith.constant 95 : index
    %176 = vector.load %arg12[%c4_49, %c95] : memref<8x512xf32, #tpu.memory_space<vmem>>, vector<4x256xf32>
    %177 = vector.broadcast %127 : vector<4x1xf32> to vector<4x256xf32>
    %178 = arith.mulf %177, %176 : vector<4x256xf32>
    %c4_50 = arith.constant 4 : index
    %c111_51 = arith.constant 111 : index
    %179 = vector.load %arg12[%c4_50, %c111_51] : memref<8x512xf32, #tpu.memory_space<vmem>>, vector<4x256xf32>
    %180 = vector.broadcast %132 : vector<4x1xf32> to vector<4x256xf32>
    %181 = arith.mulf %180, %179 : vector<4x256xf32>
    %182 = arith.addf %178, %181 : vector<4x256xf32>
    %c4_52 = arith.constant 4 : index
    %c127_53 = arith.constant 127 : index
    %183 = vector.load %arg12[%c4_52, %c127_53] : memref<8x512xf32, #tpu.memory_space<vmem>>, vector<4x256xf32>
    %184 = vector.broadcast %137 : vector<4x1xf32> to vector<4x256xf32>
    %185 = arith.mulf %184, %183 : vector<4x256xf32>
    %186 = arith.addf %182, %185 : vector<4x256xf32>
    %c4_54 = arith.constant 4 : index
    %c143_55 = arith.constant 143 : index
    %187 = vector.load %arg12[%c4_54, %c143_55] : memref<8x512xf32, #tpu.memory_space<vmem>>, vector<4x256xf32>
    %188 = vector.broadcast %142 : vector<4x1xf32> to vector<4x256xf32>
    %189 = arith.mulf %188, %187 : vector<4x256xf32>
    %190 = arith.addf %186, %189 : vector<4x256xf32>
    %c4_56 = arith.constant 4 : index
    %c159 = arith.constant 159 : index
    %191 = vector.load %arg12[%c4_56, %c159] : memref<8x512xf32, #tpu.memory_space<vmem>>, vector<4x256xf32>
    %192 = vector.broadcast %147 : vector<4x1xf32> to vector<4x256xf32>
    %193 = arith.mulf %192, %191 : vector<4x256xf32>
    %194 = arith.addf %190, %193 : vector<4x256xf32>
    %195 = vector.broadcast %51 : vector<1x256xf32> to vector<4x256xf32>
    %196 = arith.mulf %194, %195 : vector<4x256xf32>
    %197 = arith.addf %175, %196 : vector<4x256xf32>
    %c4_57 = arith.constant 4 : index
    %c96 = arith.constant 96 : index
    %198 = vector.load %arg12[%c4_57, %c96] : memref<8x512xf32, #tpu.memory_space<vmem>>, vector<4x256xf32>
    %199 = vector.broadcast %128 : vector<4x1xf32> to vector<4x256xf32>
    %200 = arith.mulf %199, %198 : vector<4x256xf32>
    %c4_58 = arith.constant 4 : index
    %c112_59 = arith.constant 112 : index
    %201 = vector.load %arg12[%c4_58, %c112_59] : memref<8x512xf32, #tpu.memory_space<vmem>>, vector<4x256xf32>
    %202 = vector.broadcast %133 : vector<4x1xf32> to vector<4x256xf32>
    %203 = arith.mulf %202, %201 : vector<4x256xf32>
    %204 = arith.addf %200, %203 : vector<4x256xf32>
    %c4_60 = arith.constant 4 : index
    %c128_61 = arith.constant 128 : index
    %205 = vector.load %arg12[%c4_60, %c128_61] : memref<8x512xf32, #tpu.memory_space<vmem>>, vector<4x256xf32>
    %206 = vector.broadcast %138 : vector<4x1xf32> to vector<4x256xf32>
    %207 = arith.mulf %206, %205 : vector<4x256xf32>
    %208 = arith.addf %204, %207 : vector<4x256xf32>
    %c4_62 = arith.constant 4 : index
    %c144_63 = arith.constant 144 : index
    %209 = vector.load %arg12[%c4_62, %c144_63] : memref<8x512xf32, #tpu.memory_space<vmem>>, vector<4x256xf32>
    %210 = vector.broadcast %143 : vector<4x1xf32> to vector<4x256xf32>
    %211 = arith.mulf %210, %209 : vector<4x256xf32>
    %212 = arith.addf %208, %211 : vector<4x256xf32>
    %c4_64 = arith.constant 4 : index
    %c160 = arith.constant 160 : index
    %213 = vector.load %arg12[%c4_64, %c160] : memref<8x512xf32, #tpu.memory_space<vmem>>, vector<4x256xf32>
    %214 = vector.broadcast %148 : vector<4x1xf32> to vector<4x256xf32>
    %215 = arith.mulf %214, %213 : vector<4x256xf32>
    %216 = arith.addf %212, %215 : vector<4x256xf32>
    %217 = arith.addf %197, %216 : vector<4x256xf32>
    %c4_65 = arith.constant 4 : index
    %c97 = arith.constant 97 : index
    %218 = vector.load %arg12[%c4_65, %c97] : memref<8x512xf32, #tpu.memory_space<vmem>>, vector<4x256xf32>
    %219 = vector.broadcast %129 : vector<4x1xf32> to vector<4x256xf32>
    %220 = arith.mulf %219, %218 : vector<4x256xf32>
    %c4_66 = arith.constant 4 : index
    %c113_67 = arith.constant 113 : index
    %221 = vector.load %arg12[%c4_66, %c113_67] : memref<8x512xf32, #tpu.memory_space<vmem>>, vector<4x256xf32>
    %222 = vector.broadcast %134 : vector<4x1xf32> to vector<4x256xf32>
    %223 = arith.mulf %222, %221 : vector<4x256xf32>
    %224 = arith.addf %220, %223 : vector<4x256xf32>
    %c4_68 = arith.constant 4 : index
    %c129_69 = arith.constant 129 : index
    %225 = vector.load %arg12[%c4_68, %c129_69] : memref<8x512xf32, #tpu.memory_space<vmem>>, vector<4x256xf32>
    %226 = vector.broadcast %139 : vector<4x1xf32> to vector<4x256xf32>
    %227 = arith.mulf %226, %225 : vector<4x256xf32>
    %228 = arith.addf %224, %227 : vector<4x256xf32>
    %c4_70 = arith.constant 4 : index
    %c145_71 = arith.constant 145 : index
    %229 = vector.load %arg12[%c4_70, %c145_71] : memref<8x512xf32, #tpu.memory_space<vmem>>, vector<4x256xf32>
    %230 = vector.broadcast %144 : vector<4x1xf32> to vector<4x256xf32>
    %231 = arith.mulf %230, %229 : vector<4x256xf32>
    %232 = arith.addf %228, %231 : vector<4x256xf32>
    %c4_72 = arith.constant 4 : index
    %c161 = arith.constant 161 : index
    %233 = vector.load %arg12[%c4_72, %c161] : memref<8x512xf32, #tpu.memory_space<vmem>>, vector<4x256xf32>
    %234 = vector.broadcast %149 : vector<4x1xf32> to vector<4x256xf32>
    %235 = arith.mulf %234, %233 : vector<4x256xf32>
    %236 = arith.addf %232, %235 : vector<4x256xf32>
    %237 = vector.broadcast %58 : vector<1x256xf32> to vector<4x256xf32>
    %238 = arith.mulf %236, %237 : vector<4x256xf32>
    %239 = arith.addf %217, %238 : vector<4x256xf32>
    %c4_73 = arith.constant 4 : index
    %c98 = arith.constant 98 : index
    %240 = vector.load %arg12[%c4_73, %c98] : memref<8x512xf32, #tpu.memory_space<vmem>>, vector<4x256xf32>
    %241 = vector.broadcast %130 : vector<4x1xf32> to vector<4x256xf32>
    %242 = arith.mulf %241, %240 : vector<4x256xf32>
    %c4_74 = arith.constant 4 : index
    %c114 = arith.constant 114 : index
    %243 = vector.load %arg12[%c4_74, %c114] : memref<8x512xf32, #tpu.memory_space<vmem>>, vector<4x256xf32>
    %244 = vector.broadcast %135 : vector<4x1xf32> to vector<4x256xf32>
    %245 = arith.mulf %244, %243 : vector<4x256xf32>
    %246 = arith.addf %242, %245 : vector<4x256xf32>
    %c4_75 = arith.constant 4 : index
    %c130 = arith.constant 130 : index
    %247 = vector.load %arg12[%c4_75, %c130] : memref<8x512xf32, #tpu.memory_space<vmem>>, vector<4x256xf32>
    %248 = vector.broadcast %140 : vector<4x1xf32> to vector<4x256xf32>
    %249 = arith.mulf %248, %247 : vector<4x256xf32>
    %250 = arith.addf %246, %249 : vector<4x256xf32>
    %c4_76 = arith.constant 4 : index
    %c146 = arith.constant 146 : index
    %251 = vector.load %arg12[%c4_76, %c146] : memref<8x512xf32, #tpu.memory_space<vmem>>, vector<4x256xf32>
    %252 = vector.broadcast %145 : vector<4x1xf32> to vector<4x256xf32>
    %253 = arith.mulf %252, %251 : vector<4x256xf32>
    %254 = arith.addf %250, %253 : vector<4x256xf32>
    %c4_77 = arith.constant 4 : index
    %c162 = arith.constant 162 : index
    %255 = vector.load %arg12[%c4_77, %c162] : memref<8x512xf32, #tpu.memory_space<vmem>>, vector<4x256xf32>
    %256 = vector.broadcast %150 : vector<4x1xf32> to vector<4x256xf32>
    %257 = arith.mulf %256, %255 : vector<4x256xf32>
    %258 = arith.addf %254, %257 : vector<4x256xf32>
    %259 = vector.broadcast %65 : vector<1x256xf32> to vector<4x256xf32>
    %260 = arith.mulf %258, %259 : vector<4x256xf32>
    %261 = arith.addf %239, %260 : vector<4x256xf32>
    %262 = vector.broadcast %151 : vector<4x1xf32> to vector<4x256xf32>
    %263 = arith.addf %261, %262 : vector<4x256xf32>
    %cst_78 = arith.constant dense<0.000000e+00> : vector<4xf32>
    %264 = vector.multi_reduction <add>, %263, %cst_78 [1] : vector<4x256xf32> to vector<4xf32>
    %265 = vector.shape_cast %264 : vector<4xf32> to vector<4x1xf32>
    %266 = arith.addf %152, %265 : vector<4x1xf32>
    %c4_79 = arith.constant 4 : index
    %c0_80 = arith.constant 0 : index
    %267 = vector.load %arg13[%c4_79, %c0_80] : memref<8x256xf32, #tpu.memory_space<vmem>>, vector<4x256xf32>
    tpu.vector_store %arg13[%c4_79, %c0_80], %263 {strides = array<i32>} : memref<8x256xf32, #tpu.memory_space<vmem>>, vector<4x256xf32>,
    %268 = tpu.concatenate %123, %266 in 0 : vector<4x1xf32>, vector<4x1xf32> -> vector<8x1xf32>
    %cst_81 = arith.constant 3.906250e-03 : f32
    %269 = vector.broadcast %cst_81 : f32 to vector<8x1xf32>
    %270 = arith.mulf %268, %269 : vector<8x1xf32>
    %c0_82 = arith.constant 0 : index
    %c0_83 = arith.constant 0 : index
    %271 = vector.load %arg7[%c0_82, %c0_83] : memref<2x8xf32, #tpu.memory_space<vmem>>, vector<2x8xf32>
    %cst_84 = arith.constant dense<0.000000e+00> : vector<2x1xf32>
    %272 = tpu.matmul %271, %270, %cst_84 {dimension_numbers = #tpu.dot_dimension_numbers<[1], [0], [0], [1], [0, 0, 1, 1], [], []>} : vector<2x8xf32>, vector<8x1xf32>, vector<2x1xf32> -> vector<2x1xf32>
    %cst_85 = arith.constant 0.000000e+00 : f32
    %273 = vector.broadcast %cst_85 : f32 to vector<2x1xf32>
    %274 = arith.maximumf %272, %273 : vector<2x1xf32>
    %c0_86 = arith.constant 0 : index
    %c0_87 = arith.constant 0 : index
    %275 = vector.load %arg8[%c0_86, %c0_87] : memref<8x2xf32, #tpu.memory_space<vmem>>, vector<8x2xf32>
    %cst_88 = arith.constant dense<0.000000e+00> : vector<8x1xf32>
    %276 = tpu.matmul %275, %274, %cst_88 {dimension_numbers = #tpu.dot_dimension_numbers<[1], [0], [0], [1], [0, 0, 1, 1], [], []>} : vector<8x2xf32>, vector<2x1xf32>, vector<8x1xf32> -> vector<8x1xf32>
    %cst_89 = arith.constant 3.000000e+00 : f32
    %277 = vector.broadcast %cst_89 : f32 to vector<8x1xf32>
    %278 = arith.addf %276, %277 : vector<8x1xf32>
    %cst_90 = arith.constant 0.000000e+00 : f32
    %cst_91 = arith.constant 6.000000e+00 : f32
    %279 = vector.broadcast %cst_90 : f32 to vector<8x1xf32>
    %280 = arith.maximumf %279, %278 : vector<8x1xf32>
    %281 = vector.broadcast %cst_91 : f32 to vector<8x1xf32>
    %282 = arith.minimumf %281, %280 : vector<8x1xf32>
    %cst_92 = arith.constant 0.166666672 : f32
    %283 = vector.broadcast %cst_92 : f32 to vector<8x1xf32>
    %284 = arith.mulf %282, %283 : vector<8x1xf32>
    %c0_93 = arith.constant 0 : index
    %c0_94 = arith.constant 0 : index
    %285 = vector.load %arg13[%c0_93, %c0_94] : memref<8x256xf32, #tpu.memory_space<vmem>>, vector<8x256xf32>
    %286 = vector.broadcast %284 : vector<8x1xf32> to vector<8x256xf32>
    %287 = arith.mulf %285, %286 : vector<8x256xf32>
    %cst_95 = arith.constant 3.000000e+00 : f32
    %288 = vector.broadcast %cst_95 : f32 to vector<8x256xf32>
    %289 = arith.addf %287, %288 : vector<8x256xf32>
    %cst_96 = arith.constant 0.000000e+00 : f32
    %cst_97 = arith.constant 6.000000e+00 : f32
    %290 = vector.broadcast %cst_96 : f32 to vector<8x256xf32>
    %291 = arith.maximumf %290, %289 : vector<8x256xf32>
    %292 = vector.broadcast %cst_97 : f32 to vector<8x256xf32>
    %293 = arith.minimumf %292, %291 : vector<8x256xf32>
    %294 = arith.mulf %287, %293 : vector<8x256xf32>
    %cst_98 = arith.constant 0.166666672 : f32
    %295 = vector.broadcast %cst_98 : f32 to vector<8x256xf32>
    %296 = arith.mulf %294, %295 : vector<8x256xf32>
    %c0_99 = arith.constant 0 : index
    %c0_100 = arith.constant 0 : index
    %297 = vector.load %arg9[%c0_99, %c0_100] : memref<4x8xbf16, #tpu.memory_space<vmem>>, vector<4x8xbf16>
    %298 = arith.truncf %296 : vector<8x256xf32> to vector<8x256xbf16>
    %cst_101 = arith.constant dense<0.000000e+00> : vector<4x256xf32>
    %299 = tpu.matmul %297, %298, %cst_101 {dimension_numbers = #tpu.dot_dimension_numbers<[1], [0], [0], [1], [0, 0, 1, 1], [], []>} : vector<4x8xbf16>, vector<8x256xbf16>, vector<4x256xf32> -> vector<4x256xf32>
    %c0_102 = arith.constant 0 : index
    %c0_103 = arith.constant 0 : index
    %300 = vector.load %arg10[%c0_102, %c0_103] : memref<4x1xf32, #tpu.memory_space<vmem>>, vector<4x1xf32>
    %301 = vector.broadcast %300 : vector<4x1xf32> to vector<4x256xf32>
    %302 = arith.addf %299, %301 : vector<4x256xf32>
    %c0_104 = arith.constant 0 : index
    %c0_105 = arith.constant 0 : index
    %c0_106 = arith.constant 0 : index
    %303 = vector.load %arg1[%c0_104, %c0_105, %c0_106] : memref<1x4x256xbf16, #tpu.memory_space<vmem>>, vector<1x4x256xbf16>
    %304 = vector.shape_cast %303 : vector<1x4x256xbf16> to vector<4x256xbf16>
    %305 = arith.extf %304 : vector<4x256xbf16> to vector<4x256xf32>
    %306 = arith.addf %302, %305 : vector<4x256xf32>
    %c0_107 = arith.constant 0 : index
    %c0_108 = arith.constant 0 : index
    %c0_109 = arith.constant 0 : index
    %307 = vector.load %arg11[%c0_107, %c0_108, %c0_109] : memref<1x4x256xf32, #tpu.memory_space<vmem>>, vector<1x4x256xf32>
    %308 = vector.shape_cast %307 : vector<1x4x256xf32> to vector<4x256xf32>
    %309 = vector.shape_cast %306 : vector<4x256xf32> to vector<1x4x256xf32>
    tpu.vector_store %arg11[%c0_107, %c0_108, %c0_109], %309 {strides = array<i32>} : memref<1x4x256xf32, #tpu.memory_space<vmem>>, vector<1x4x256xf32>,
    return
  }
  func.func @transform_0(%arg0: i32) -> (i32, i32, i32) {
    %c0_i32 = arith.constant 0 : i32
    %c0_i32_0 = arith.constant 0 : i32
    %c0_i32_1 = arith.constant 0 : i32
    return %arg0, %c0_i32, %c0_i32_0 : i32, i32, i32
  }
  func.func @transform_1(%arg0: i32) -> (i32, i32) {
    %c0_i32 = arith.constant 0 : i32
    %c0_i32_0 = arith.constant 0 : i32
    %c0_i32_1 = arith.constant 0 : i32
    return %c0_i32, %c0_i32_0 : i32, i32
  }
  func.func @transform_2(%arg0: i32) -> (i32, i32) {
    %c0_i32 = arith.constant 0 : i32
    %c0_i32_0 = arith.constant 0 : i32
    %c0_i32_1 = arith.constant 0 : i32
    return %c0_i32, %c0_i32_0 : i32, i32
  }
  func.func @transform_3(%arg0: i32) -> (i32, i32) {
    %c0_i32 = arith.constant 0 : i32
    %c0_i32_0 = arith.constant 0 : i32
    %c0_i32_1 = arith.constant 0 : i32
    return %c0_i32, %c0_i32_0 : i32, i32
  }
  func.func @transform_4(%arg0: i32) -> (i32, i32) {
    %c0_i32 = arith.constant 0 : i32
    %c0_i32_0 = arith.constant 0 : i32
    %c0_i32_1 = arith.constant 0 : i32
    return %c0_i32, %c0_i32_0 : i32, i32
  }
  func.func @transform_5(%arg0: i32) -> (i32, i32) {
    %c0_i32 = arith.constant 0 : i32
    %c0_i32_0 = arith.constant 0 : i32
    %c0_i32_1 = arith.constant 0 : i32
    return %c0_i32, %c0_i32_0 : i32, i32
  }
  func.func @transform_6(%arg0: i32) -> (i32, i32) {
    %c0_i32 = arith.constant 0 : i32
    %c0_i32_0 = arith.constant 0 : i32
    %c0_i32_1 = arith.constant 0 : i32
    return %c0_i32, %c0_i32_0 : i32, i32
  }
  func.func @transform_7(%arg0: i32) -> (i32, i32) {
    %c0_i32 = arith.constant 0 : i32
    %c0_i32_0 = arith.constant 0 : i32
    %c0_i32_1 = arith.constant 0 : i32
    return %c0_i32, %c0_i32_0 : i32, i32
  }
  func.func @transform_8(%arg0: i32) -> (i32, i32) {
    %c0_i32 = arith.constant 0 : i32
    %c0_i32_0 = arith.constant 0 : i32
    %c0_i32_1 = arith.constant 0 : i32
    return %c0_i32, %c0_i32_0 : i32, i32
  }
  func.func @transform_9(%arg0: i32) -> (i32, i32) {
    %c0_i32 = arith.constant 0 : i32
    %c0_i32_0 = arith.constant 0 : i32
    %c0_i32_1 = arith.constant 0 : i32
    return %c0_i32, %c0_i32_0 : i32, i32
  }
  func.func @transform_10(%arg0: i32) -> (i32, i32, i32) {
    %c0_i32 = arith.constant 0 : i32
    %c0_i32_0 = arith.constant 0 : i32
    %c0_i32_1 = arith.constant 0 : i32
    return %arg0, %c0_i32, %c0_i32_0 : i32, i32, i32
  }
}

</mosaic_0001>

<bundles_post_ra>
// kernel: tpu_custom_call.1
= control target key start
LH: loop header
LB: loop body
LE: loop exit
PB: predicated region body
PF: predicated region fallthrough
CT: control target
= control target key end

     0   :  { %s2772_s0 = inlined_call_operand.vmem [shape: bf16[2,4,256], index: 0, kind: input, shape index: {}]   ;;  %s2773_s1 = inlined_call_operand.vmem [shape: bf16[8,4], index: 1, kind: input, shape index: {}]   ;;  %s2774_s2 = inlined_call_operand.vmem [shape: f32[8,1], index: 2, kind: input, shape index: {}]   ;;  %s2775_s3 = inlined_call_operand.vmem [shape: f32[4,9], index: 3, kind: input, shape index: {}]   ;;  %s2776_s4 = inlined_call_operand.vmem [shape: f32[4,25], index: 4, kind: input, shape index: {}]   ;;  %s2777_s5 = inlined_call_operand.vmem [shape: f32[8,1], index: 5, kind: input, shape index: {}]   ;;  %s2778_s6 = inlined_call_operand.vmem [shape: f32[2,8], index: 6, kind: input, shape index: {}]   ;;  %s2779_s7 = inlined_call_operand.vmem [shape: f32[8,2], index: 7, kind: input, shape index: {}]   ;;  %s2780_s8 = inlined_call_operand.vmem [shape: bf16[4,8], index: 8, kind: input, shape index: {}]   ;;  %s2781_s9 = inlined_call_operand.vmem [shape: f32[4,1], index: 9, kind: input, shape index: {}]   ;;  %s2782_s10 = inlined_call_operand.hbm [shape: f32[2,4,256], index: 10, kind: output, shape index: {}]  }
   0x1   :  { %2837 = sst [smem:[#allocation42_spill]] %s2772_s0 }
   0x2   :  { %15 = vsyncpa [#allocation5], 0 }
   0x3   :  { %17 = vsyncpa [#allocation5 + $0x1], 0  ;;  %s1960_s13 = smov 0   ;;  %s1962_s14 = smov 0  }
   0x4   :  { %s1964_s15 = smov 0   ;;  %s1966_s16 = smov 0  }
   0x5 LB: > { %s1981_s17 = sadd.s32 4294967295, %s1851_s16   ;;  %s1612_s18 = sadd.s32 4294967294, %s1851_s16   ;;  %s1851_s16 = sphi %s1966_s16, %s2933_s16   ;;  %s1847_s15 = sphi %s1964_s15, %s2932_s15   ;;  %s1843_s14 = sphi %s1962_s14, %s2931_s14   ;;  %s1839_s13 = sphi %s1960_s13, %s2930_s13  }
   0x6   : > { %s1985_s19 = sadd.s32 1, %s1851_s16   ;;  %s245_s20 = sadd.s32 1, %s1847_s15 }
   0x7   : > { %s242_s21 = ssub.s32 %s1851_s16, %s1985_s19  ;;  %p255_p0 = scmp.ne.s32.totalorder %s1847_s15, %s1843_s14 }
   0x8   : > { %p243_p1 = scmp.eq.s32.totalorder %s242_s21, 0  ;;  %p256_p2 = scmp.eq.s32.totalorder %s1981_s17, 1 }
   0x9   : > { %p261_p3 = scmp.ne.s32.totalorder %s1843_s14, %s1839_s13  ;;  %p262_p4 = scmp.eq.s32.totalorder %s1612_s18, 1 }
   0xa   : > { %s1996_s22 = scalar_select %p243_p1, %s1847_s15, %s245_s20  }
   0xb   : > { %p1998_p5 = por %p256_p2, %p255_p0  ;;  %p2002_p6 = por %p262_p4, %p261_p3 }
   0xc   : > { %p1615_p7 = scmp.ge.s32.totalorder %s1851_s16, 1  ;;  %p315_p8 = scmp.lt.s32.totalorder %s1851_s16, 3 }
   0xe   : > { %p316_p9 = pnand %p1615_p7, %p315_p8 }
  0x10   : > { %319 = sbr.rel (%p316_p9) target bundleno = 1566 (0x61e), region = 60 }
  0x15   : > { %p353_p10 = scmp.lt.s32.totalorder %s1981_s17, 1  ;;  %v442_v0 = vlaneseq  ;;  %v2812_v1 = vmov 0   ;;  %v2013_v2 = vld [vmem:[%s2775_s3] sm:$0xf]  ;;  %v1854_v3 = vmov 4   ;;  %v1855_v5 = vmov 0.0  }
  0x16   : > { %419 = vmatprep.mubr.bf16.mxu0 %v2812_v1  ;;  %1746 = vset.pattern.permute.xlu0 %v1854_v3  ;;  %438 = vst [vmem:[#allocation2 + $0x8] sm:$0xff] %v1855_v5  ;;  %439 = vst [vmem:[#allocation2] sm:$0xff] %v1855_v5  ;;  %v1856_v6 = vmov 5   ;;  %vm380_vm0 = vcmask 1041408   ;;  %s2840_s0 = sld [smem:[#allocation42_spill]]  ;;  %v1857_v11 = vmov 2  }
  0x17   : > { %s354_s27 = scalar_select %p353_p10, %s1981_s17, 1  ;;  %v443_v4 = vand.u32 127, %v442_v0  ;;  %1651 = vmatprep.subr.mxu1 %v1855_v5  ;;  %600 = vperm.xlu0 %1746, %v2013_v2   ;;  %v1858_v14 = vmov 7   ;;  %v360_v15 = vld [vmem:[%s2773_s1] sm:$0xf]  ;;  %vm376_vm1 = vcmask 31744  }
  0x18   : > { %1747 = vset.pattern.permute.xlu1 %v1856_v6  ;;  %v361_v16 = vld [vmem:[%s2774_s2] sm:$0xff]  ;;  %v1859_v19 = vmov 8   ;;  %v1860_v21 = vmov 6   ;;  %s2783_s25 = smov 111   ;;  %v1862_v25 = vmov 1   ;;  %s2789_s30 = smov 113  }
  0x19   : > { %s1640_s28 = sshll.u32 %s354_s27, 2  ;;  %v444_v7 = vadd.s32 128, %v443_v4  ;;  %668 = vperm.xlu1 %1747, %v2013_v2   ;;  %v2027_v12 = vand.u32 15, %v443_v4  ;;  %v510_v22 = vld [vmem:[%s2777_s5] sm:$0xf]  ;;  %v1864_v28 = vmov 11  }
  0x1a   : > { %v2070_v27 = vld [vmem:[%s2776_s4] sm:$0xf]  ;;  %v1865_v29 = vmov 15   ;;  %v1866_v31 = vmov 10   ;;  %v1867_v33 = vmov 16   ;;  %s2803_s12 = smov 34  }
  0x1b   : > { %1752 = vset.pattern.permute.xlu0 %v1857_v11  ;;  %2841 = vst [vmem:[#allocation7_spill] sm:$0xff] %v2027_v12  ;;  %v2029_v13 = vand.u32 15, %v444_v7  ;;  %vm479_vm2 = vcmp.ge.s32.totalorder %v2027_v12, 1  ;;  %vm491_vm4 = vcmp.lt.s32.totalorder %v2027_v12, 15  ;;  %v1869_v34 = vmov 3   ;;  %s2799_s18 = smov 18  }
  0x1c   : > { %s2022_s11 = scalar_lea.vmem %s2840_s0, %s1640_s28  ;;  %661 = vperm.xlu0 %1752, %v2013_v2   ;;  %v2044_v17 = vsel %vm479_vm2, 1.0, %v1855_v5  ;;  %v2060_v23 = vsel %vm491_vm4, 1.0, %v1855_v5  ;;  %s2802_s20 = smov 33   ;;  %v1872_v35 = vmov 20   ;;  %v1874_v36 = vmov 12  }
  0x1d   : > { %v1619_v8 = vld.sshfl [vmem:[%s2022_s11] sm:$0x33 pattern:$0x76325410]  ;;  %2842 = vst [vmem:[#allocation8_spill] sm:$0xff] %v2029_v13  ;;  %1748 = vset.pattern.permute.xlu1 %v1858_v14  ;;  %vm480_vm3 = vcmp.ge.s32.totalorder %v2029_v13, 1 }
  0x1e   : > { %v375_v9 = vcombine.high %v1619_v8, %v1619_v8  ;;  %v382_v10 = vsel %vm380_vm0, %v1619_v8, 0  ;;  %619 = vperm.xlu1 %1748, %v2013_v2   ;;  %2843 = vst [vmem:[#allocation9_spill] sm:$0xff] %v2044_v17  ;;  %v2046_v18 = vsel %vm480_vm3, 1.0, %v1855_v5  ;;  %vm492_vm5 = vcmp.lt.s32.totalorder %v2029_v13, 15  ;;  %2845 = vst [vmem:[#allocation11_spill] sm:$0xff] %v2060_v23  ;;  %s2797_s21 = smov 17  }
  0x1f   : > { %2844 = vst [vmem:[#allocation10_spill] sm:$0xff] %v2046_v18  ;;  %v1759_v20 = vpack.i.bf16 %v2046_v18, %v2044_v17  ;;  %v2062_v24 = vsel %vm492_vm5, 1.0, %v1855_v5  ;;  %v780_v30 = vld [vmem:[#allocation2 + $0x8] sm:$0xf0]  ;;  %v847_v37 = vld [vmem:[#allocation2] sm:$0xf0] }
  0x20   : > { %1620 = vmatprep.subr.msk.bf16.mxu0 %vm380_vm0, %v375_v9  ;;  %1753 = vset.pattern.permute.xlu0 %v2812_v1  ;;  %2846 = vst [vmem:[#allocation12_spill] sm:$0xff] %v2062_v24  ;;  %v1754_v26 = vpack.i.bf16 %v2062_v24, %v2060_v23  ;;  %v2079_v32 = vrot.slane %v780_v30, 4  ;;  %v1875_v38 = vmov 9   ;;  %v2099_v39 = vrot.slane %v847_v37, 4  ;;  %s2787_s26 = smov 114   ;;  %s2800_s27 = smov 2  }
  0x21   : > { %402 = vmatpush1.bf16.msra.mxu0 %v382_v10  ;;  %364 = vperm.xlu0 %1753, %v361_v16   ;;  %v1877_v40 = vmov 17   ;;  %s2785_s28 = smov 32   ;;  %v1880_v41 = vmov 21   ;;  %s2793_s29 = smov 1   ;;  %v1882_v42 = vmov 18   ;;  %v1883_v43 = vmov 13  }
  0x22   : > { %1646 = vmatprep.subr.mxu0 %v1855_v5  ;;  %1749 = vset.pattern.permute.xlu1 %v1859_v19  ;;  %v1884_v44 = vmov 14   ;;  %v549_v45 = vld [vmem:[#allocation2] sm:$0xf]  ;;  %v1892_v60 = vmov 22   ;;  %v2162_v0 = vld [vmem:[#allocation2 + $0x8] sm:$0xf] }
  0x23   : > { %692 = vperm.xlu1 %1749, %v2013_v2   ;;  %vm538_vm6 = vcmask 916480   ;;  %vm764_vm7 = vcmask 138240   ;;  %vm906_vm8 = vcmask 269312   ;;  %vm941_vm9 = vcmask 7168  }
  0x24   : > { %1621 = vmatmul.mubr.msk.bf16.vlgmr.msra.gmra.mxu0 %vm376_vm1, %v360_v15  ;;  %vm566_vm10 = vcmask 785408   ;;  %vm800_vm11 = vcmask 277504   ;;  %vm721_vm12 = vcmask 924672   ;;  %vm1001_vm13 = vcmask 261120  }
  0x25   : > { %516 = vperm.xlu0 %1753, %v2013_v2   ;;  %vm1085_vm14 = vcmask 252928   ;;  %vm1180_vm15 = vcmask 244736   ;;  %vm883_vm1 = vcmask 801792   ;;  %vm1197_vm2 = vcmask 113664  }
  0x26   : > { %vm1018_vm3 = vcmask 130048   ;;  %vm1102_vm4 = vcmask 121856   ;;  %vm978_vm5 = vcmask 793600  }
  0x27   : > { %1750 = vset.pattern.permute.xlu1 %v1860_v21 }
  0x28   : > { %551 = vperm.xlu1 %1750, %v2013_v2  }
  0x29   : > { %1760 = vrot.lane.b32.xlu0 %v1759_v20, %s2783_s25  ;;  %s2801_s25 = smov 16  }
  0x2c   : > { %1751 = vset.pattern.permute.xlu1 %v1862_v25 }
  0x2d   : > { %749 = vperm.xlu0 %1753, %v510_v22   ;;  %593 = vperm.xlu1 %1751, %v2013_v2  }
  0x31   : > { %1765 = vset.pattern.permute.xlu0 %v1862_v25  ;;  %1755 = vrot.lane.b32.xlu1 %v1754_v26, %s2789_s30 }
  0x32   : > { %897 = vperm.xlu0 %1765, %v2070_v27   ;;  %1764 = vset.pattern.permute.xlu1 %v1856_v6 }
  0x35   : > { %808 = vperm.xlu1 %1764, %v2070_v27  }
  0x36   : > { %1768 = vset.pattern.permute.xlu0 %v1864_v28 }
  0x37   : > { %932 = vperm.xlu0 %1768, %v2070_v27  }
  0x39   : > { %1766 = vset.pattern.permute.xlu1 %v1860_v21 }
  0x3a   : > { %914 = vperm.xlu1 %1766, %v2070_v27  }
  0x3b   : > { %1769 = vset.pattern.permute.xlu0 %v1865_v29 }
  0x3c   : > { %849 = vperm.xlu0 %1769, %v2070_v27  }
  0x3e   : > { %1767 = vset.pattern.permute.xlu1 %v1866_v31 }
  0x3f   : > { %827 = vperm.xlu1 %1767, %v2070_v27  }
  0x40   : > { %1770 = vset.pattern.permute.xlu0 %v1867_v33 }
  0x41   : > { %951 = vperm.xlu0 %1770, %v2070_v27  }
  0x43   : > { %794 = vrot.lane.b32.xlu1 %v2079_v32, %s2803_s12 }
  0x44   : > { %1772 = vset.pattern.permute.xlu1 %v1857_v11 }
  0x45   : > { %1771 = vset.pattern.permute.xlu0 %v1869_v34 }
  0x46   : > { %523 = vperm.xlu0 %1771, %v2013_v2  }
  0x47   : > { %811 = vrot.lane.b32.xlu1 %v2079_v32, %s2799_s18 }
  0x4a   : > { %1076 = vperm.xlu0 %1771, %v2070_v27  }
  0x4b   : > { %900 = vrot.lane.b32.xlu1 %v2079_v32, %s2802_s20 }
  0x4e   : > { %1775 = vset.pattern.permute.xlu0 %v1872_v35 }
  0x4f   : > { %874 = vperm.xlu0 %1775, %v2070_v27   ;;  %917 = vrot.lane.b32.xlu1 %v2079_v32, %s2797_s21 }
  0x53   : > { %1777 = vset.pattern.permute.xlu0 %v1874_v36  ;;  %992 = vperm.xlu1 %1772, %v2070_v27  }
  0x54   : > { %1028 = vperm.xlu0 %1777, %v2070_v27  }
  0x57   : > { %1773 = vset.pattern.permute.xlu1 %v1858_v14 }
  0x58   : > { %1009 = vperm.xlu1 %1773, %v2070_v27   ;;  %1780 = vset.pattern.permute.xlu0 %v1875_v38 }
  0x59   : > { %1188 = vperm.xlu0 %1780, %v2070_v27  }
  0x5c   : > { %1774 = vset.pattern.permute.xlu1 %v1859_v19 }
  0x5d   : > { %1093 = vperm.xlu1 %1774, %v2070_v27   ;;  %862 = vrot.lane.b32.xlu0 %v2099_v39, %s2787_s26  ;;  %s2795_s26 = smov 15  }
  0x5e   : > { %1781 = vset.pattern.permute.xlu0 %v1877_v40 }
  0x61   : > { %830 = vrot.lane.b32.xlu1 %v2079_v32, %s2800_s27  ;;  %995 = vrot.lane.b32.xlu0 %v2079_v32, %s2785_s28  ;;  %s2791_s28 = smov 31  }
  0x62   : > { %1776 = vset.pattern.permute.xlu1 %v1880_v41 }
  0x65   : > { %935 = vrot.lane.b32.xlu1 %v2079_v32, %s2793_s29  ;;  %1038 = vperm.xlu0 %1781, %v2070_v27   ;;  %s2809_s29 = smov 98  }
  0x69   : > { %969 = vperm.xlu1 %1776, %v2070_v27   ;;  %1782 = vset.pattern.permute.xlu0 %v1882_v42 }
  0x6d   : > { %1778 = vset.pattern.permute.xlu1 %v1883_v43 }
  0x6e   : > { %1112 = vperm.xlu1 %1778, %v2070_v27  }
  0x72   : > { %1779 = vset.pattern.permute.xlu1 %v1854_v3 }
  0x73   : > { %1171 = vperm.xlu1 %1779, %v2070_v27  }
  0x77   : > { %958 = vrot.lane.b32.xlu1 %v2099_v39, %s2789_s30  ;;  %s1888_s30 = smov 112  }
  0x78   : > { %1783 = vset.pattern.permute.xlu1 %v1884_v44 }
  0x7b   : > { %1012 = vrot.lane.b32.xlu1 %v2079_v32, %s2801_s25 }
  0x7f   : > { %1079 = vrot.lane.b32.xlu1 %v2079_v32, %s2791_s28  ;;  %s2805_s28 = smov 96  }
  0x83   : > { %1096 = vrot.lane.b32.xlu1 %v2079_v32, %s2795_s26  ;;  %s2804_s26 = smov 97  }
  0x92   : > { %v2124_v46 = vpop.permute.xlu0 %600 }
  0x94   : > { %v2126_v47 = vpop.permute.xlu1 %668 }
  0x95   : > { %v673_v48 = vmul.f32 %v2126_v47, %v549_v45 }
  0x97   : > { %681 = vrot.lane.b32.xlu0 %v673_v48, %s1888_s30  ;;  %v2130_v49 = vpop.permute.xlu0 %661 }
  0x99   : > { %v2132_v50 = vpop.permute.xlu1 %619 }
  0x9a   : > { %v624_v51 = vmul.f32 %v2132_v50, %v549_v45 }
  0x9c   : > { %632 = vrot.lane.b32.xlu1 %v624_v51, %s2805_s28  ;;  %v365_v52 = vpop.permute.xlu0 %364 }
  0x9e   : > { %v2136_v53 = vpop.permute.xlu1 %692 }
  0x9f   : > { %v697_v54 = vmul.f32 %v2136_v53, %v549_v45 }
  0xa0   : > { %1207 = vperm.xlu1 %1783, %v2070_v27   ;;  %v2140_v55 = vpop.permute.xlu0 %516 }
  0xa1   : > { %705 = vrot.lane.b32.xlu0 %v697_v54, %s2805_s28 }
  0xa3   : > { %v2166_v3 = vpop.permute.xlu1 %551 }
  0xa4   : > { %881 = vrot.lane.b32.xlu1 %v2099_v39, %s2809_s29  ;;  %v2145_v56 = vpop.permute.xlu0 %1760  ;;  %v556_v4 = vmul.f32 %v2166_v3, %v549_v45 }
  0xa5   : > { %2847 = vst [vmem:[#allocation13_spill] sm:$0xff] %v2145_v56  ;;  %1130 = vperm.xlu0 %1782, %v2070_v27   ;;  %1784 = vset.pattern.permute.xlu1 %v1892_v60 }
  0xa8   : > { %v2148_v57 = vpop.permute.xlu0 %749  ;;  %v2171_v5 = vpop.permute.xlu1 %593 }
  0xa9   : > { %2848 = vst [vmem:[#allocation14_spill] sm:$0xff] %v2148_v57  ;;  %976 = vrot.lane.b32.xlu0 %v2099_v39, %s2804_s26 }
  0xac   : > { %v2173_v6 = vpop.permute.xlu1 %1755 }
  0xad   : > { %v2152_v58 = vpop.permute.xlu0 %897 }
  0xb0   : > { %v2175_v8 = vpop.permute.xlu1 %808 }
  0xb1   : > { %2850 = vst [vmem:[#allocation16_spill] sm:$0xff] %v2175_v8 }
  0xb2   : > { %v2154_v59 = vpop.permute.xlu0 %932 }
  0xb5   : > { %v2177_v21 = vpop.permute.xlu1 %914 }
  0xb7   : > { %v2156_v61 = vpop.permute.xlu0 %849 }
  0xb8   : > { %2849 = vst [vmem:[#allocation15_spill] sm:$0xff] %v2156_v61 }
  0xba   : > { %v2179_v31 = vpop.permute.xlu1 %827 }
  0xbb   : > { %2851 = vst [vmem:[#allocation17_spill] sm:$0xff] %v2179_v31 }
  0xbc   : > { %v2158_v62 = vpop.permute.xlu0 %951 }
  0xbe   : > { %v2181_v34 = vpop.permute.xlu1 %794 }
  0xbf   : > { %2852 = vst [vmem:[#allocation18_spill] sm:$0xff] %v2181_v34 }
  0xc1   : > { %v2160_v63 = vpop.permute.xlu0 %523 }
  0xc2   : > { %v526_v2 = vmul.f32 %v2160_v63, %v2162_v0  ;;  %v2190_v40 = vpop.permute.xlu1 %811 }
  0xc3   : > { %2853 = vst [vmem:[#allocation19_spill] sm:$0xff] %v2190_v40 }
  0xc4   : > { %532 = vrot.lane.b32.xlu1 %v526_v2, %s1888_s30 }
  0xc6   : > { %v2200_v48 = vpop.permute.xlu1 %900 }
  0xc8   : > { %564 = vrot.lane.b32.xlu1 %v556_v4, %s2805_s28 }
  0xe4   : > { %v421_v7 = vpop.f32.mrf.mxu0 }
  0xe5   : > { %v422_v9 = vadd.f32 %v421_v7, %v365_v52 }
  0xe6   : > { %v423_v10 = vpop.f32.mrf.mxu0 }
  0xe7   : > { %v428_v11 = vadd.f32 3.0, %v422_v9  ;;  %v424_v14 = vadd.f32 %v423_v10, %v365_v52  ;;  %v2209_v52 = vpop.permute.xlu1 %917 }
  0xe8   : > { %v425_v15 = vpop.f32.mrf.mxu0 }
  0xe9   : > { %v430_v16 = vmax.f32 %v428_v11, 0.0  ;;  %v429_v19 = vadd.f32 3.0, %v424_v14 }
  0xea   : > { %v426_v20 = vpop.f32.mrf.mxu0 }
  0xeb   : > { %v432_v22 = vmin.f32 %v430_v16, 6.0  ;;  %v431_v25 = vmax.f32 %v429_v19, 0.0  ;;  %v2215_v54 = vpop.permute.xlu1 %992 }
  0xed   : > { %v434_v26 = vmul.f32 %v432_v22, %v422_v9  ;;  %v433_v28 = vmin.f32 %v431_v25, 6.0 }
  0xef   : > { %v436_v29 = vmul.f32 0.16666667, %v434_v26  ;;  %v435_v30 = vmul.f32 %v433_v28, %v424_v14  ;;  %v2221_v2 = vpop.permute.xlu1 %1009  ;;  %v1895_v28 = vmov 19  }
  0xf0   : > { %1786 = vset.pattern.permute.xlu0 %v1895_v28 }
  0xf1   : > { %440 = vst [vmem:[#allocation2 + $0x10] sm:$0xff] %v436_v29  ;;  %v437_v33 = vmul.f32 0.16666667, %v435_v30 }
  0xf3   : > { %441 = vst [vmem:[#allocation2 + $0x18] sm:$0xff] %v437_v33  ;;  %v2233_v9 = vpop.permute.xlu1 %1093 }
  0xf7   : > { %v2239_v11 = vpop.permute.xlu1 %830 }
  0xf8   : > { %v547_v35 = vld [vmem:[#allocation2 + $0x10] sm:$0xf]  ;;  %v781_v42 = vld [vmem:[#allocation2 + $0x10] sm:$0xf0]  ;;  %2859 = vst [vmem:[#allocation21_spill] sm:$0xff] %v2239_v11 }
  0xf9   : > { %v671_v36 = vmul.f32 %v2126_v47, %v547_v35  ;;  %v2184_v37 = vld [vmem:[#allocation2 + $0x10] sm:$0xf]  ;;  %v695_v41 = vmul.f32 %v2136_v53, %v547_v35  ;;  %v622_v43 = vmul.f32 %v2132_v50, %v547_v35  ;;  %v2196_v44 = vrot.slane %v781_v42, 4  ;;  %v845_v60 = vld [vmem:[#allocation2 + $0x10] sm:$0xf0] }
  0xfa   : > { %v603_v38 = vmul.f32 %v2124_v46, %v2184_v37  ;;  %v527_v45 = vmul.f32 %v2160_v63, %v2184_v37  ;;  %v554_v51 = vmul.f32 %v2166_v3, %v547_v35  ;;  %v2227_v4 = vrot.slane %v845_v60, 4  ;;  %v548_v7 = vld [vmem:[#allocation2 + $0x18] sm:$0xf]  ;;  %v782_v22 = vld [vmem:[#allocation2 + $0x18] sm:$0xf0] }
  0xfb   : > { %677 = vrot.lane.b32.xlu0 %v671_v36, %s1888_s30  ;;  %2854 = vst [vmem:[#allocation20_spill] sm:$0xff] %v2196_v44  ;;  %v623_v10 = vmul.f32 %v2132_v50, %v548_v7  ;;  %v2249_v50 = vpop.permute.xlu1 %935  ;;  %v2251_v14 = vld [vmem:[#allocation2 + $0x18] sm:$0xf]  ;;  %v555_v20 = vmul.f32 %v2166_v3, %v548_v7  ;;  %v672_v25 = vmul.f32 %v2126_v47, %v548_v7  ;;  %v846_v30 = vld [vmem:[#allocation2 + $0x18] sm:$0xf0] }
  0xfc   : > { %607 = vrot.lane.b32.xlu1 %v603_v38, %s1888_s30  ;;  %v528_v16 = vmul.f32 %v2160_v63, %v2251_v14  ;;  %v604_v19 = vmul.f32 %v2124_v46, %v2251_v14  ;;  %v2271_v63 = vrot.slane %v782_v22, 4  ;;  %v2273_v46 = vpop.permute.xlu0 %1076  ;;  %v696_v29 = vmul.f32 %v2136_v53, %v548_v7 }
  0xfd   : > { %v1896_v53 = vmov 23   ;;  %v2292_v36 = vrot.slane %v846_v30, 4 }
  0xff   : > { %701 = vrot.lane.b32.xlu0 %v695_v41, %s2805_s28  ;;  %v2257_v15 = vpop.permute.xlu1 %969 }
 0x100   : > { %628 = vrot.lane.b32.xlu1 %v622_v43, %s2805_s28  ;;  %2862 = vst [vmem:[#allocation22_spill] sm:$0xff] %v2257_v15  ;;  %v2281_v3 = vpop.permute.xlu0 %874 }
 0x101   : > { %2866 = vst [vmem:[#allocation24_spill] sm:$0xff] %v2281_v3 }
 0x103   : > { %813 = vrot.lane.b32.xlu0 %v2196_v44, %s2799_s18  ;;  %s2856_s18 = smov 1   ;;  %v2267_v26 = vpop.permute.xlu1 %1112 }
 0x104   : > { %534 = vrot.lane.b32.xlu1 %v527_v45, %s1888_s30  ;;  %2863 = vst [vmem:[#allocation23_spill] sm:$0xff] %v2267_v26  ;;  %v2288_v35 = vpop.permute.xlu0 %1028  ;;  %v1898_v45 = vmov 24  }
 0x105   : > { %2868 = vst [vmem:[#allocation25_spill] sm:$0xff] %v2288_v35 }
 0x107   : > { %919 = vrot.lane.b32.xlu0 %v2196_v44, %s2797_s21  ;;  %s2855_s21 = smov 15   ;;  %v2279_v47 = vpop.permute.xlu1 %1171 }
 0x108   : > { %560 = vrot.lane.b32.xlu1 %v554_v51, %s2805_s28  ;;  %v2295_v38 = vpop.permute.xlu0 %1188 }
 0x10b   : > { %832 = vrot.lane.b32.xlu0 %v2196_v44, %s2800_s27  ;;  %s2857_s27 = smov 114   ;;  %v2286_v33 = vpop.permute.xlu1 %958 }
 0x10c   : > { %796 = vrot.lane.b32.xlu1 %v2196_v44, %s2803_s12  ;;  %s2860_s12 = smov 32   ;;  %v2305_v42 = vpop.permute.xlu0 %862 }
 0x10d   : > { %2871 = vst [vmem:[#allocation27_spill] sm:$0xff] %v2305_v42 }
 0x10f   : > { %1014 = vrot.lane.b32.xlu0 %v2196_v44, %s2801_s25  ;;  %s2858_s25 = smov 113   ;;  %v2299_v41 = vpop.permute.xlu1 %1012 }
 0x110   : > { %902 = vrot.lane.b32.xlu1 %v2196_v44, %s2802_s20  ;;  %s2807_s20 = smov 127   ;;  %2869 = vst [vmem:[#allocation26_spill] sm:$0xff] %v2299_v41  ;;  %v2315_v51 = vpop.permute.xlu0 %995 }
 0x111   : > { %2873 = vst [vmem:[#allocation28_spill] sm:$0xff] %v2315_v51 }
 0x113   : > { %1098 = vrot.lane.b32.xlu0 %v2196_v44, %s2855_s21  ;;  %v2309_v43 = vpop.permute.xlu1 %1079 }
 0x114   : > { %937 = vrot.lane.b32.xlu1 %v2196_v44, %s2856_s18 }
 0x117   : > { %972 = vrot.lane.b32.xlu0 %v2227_v4, %s2804_s26  ;;  %s2861_s26 = smov 31   ;;  %v2319_v60 = vpop.permute.xlu1 %1096 }
 0x118   : > { %858 = vrot.lane.b32.xlu1 %v2227_v4, %s2857_s27  ;;  %2875 = vst [vmem:[#allocation29_spill] sm:$0xff] %v2319_v60 }
 0x11b   : > { %630 = vrot.lane.b32.xlu0 %v623_v10, %s2805_s28  ;;  %s2810_s28 = smov 30   ;;  %v2329_v7 = vpop.permute.xlu1 %632 }
 0x11c   : > { %954 = vrot.lane.b32.xlu1 %v2227_v4, %s2858_s25 }
 0x11f   : > { %1115 = vrot.lane.b32.xlu0 %v2227_v4, %s2807_s20  ;;  %v2335_v10 = vpop.permute.xlu1 %1207 }
 0x120   : > { %997 = vrot.lane.b32.xlu1 %v2196_v44, %s2860_s12  ;;  %2879 = vst [vmem:[#allocation31_spill] sm:$0xff] %v2335_v10 }
 0x123   : > { %1119 = vrot.lane.b32.xlu0 %v2099_v39, %s2807_s20  ;;  %s2864_s20 = smov 96  }
 0x124   : > { %1081 = vrot.lane.b32.xlu1 %v2196_v44, %s2861_s26 }
 0x127   : > { %1174 = vrot.lane.b32.xlu0 %v2079_v32, %s2810_s28  ;;  %s2867_s28 = smov 33  }
 0x128   : > { %877 = vrot.lane.b32.xlu1 %v2227_v4, %s2809_s29  ;;  %s2865_s29 = smov 34  }
 0x12b   : > { %536 = vrot.lane.b32.xlu0 %v528_v16, %s1888_s30 }
 0x12c   : > { %609 = vrot.lane.b32.xlu1 %v604_v19, %s1888_s30 }
 0x12f   : > { %562 = vrot.lane.b32.xlu0 %v555_v20, %s2864_s20  ;;  %v2343_v20 = vpop.permute.xlu1 %881 }
 0x130   : > { %679 = vrot.lane.b32.xlu1 %v672_v25, %s1888_s30  ;;  %2881 = vst [vmem:[#allocation32_spill] sm:$0xff] %v2343_v20 }
 0x133   : > { %798 = vrot.lane.b32.xlu0 %v2271_v63, %s2865_s29  ;;  %s2874_s29 = smov 98  }
 0x134   : > { %703 = vrot.lane.b32.xlu1 %v696_v29, %s2864_s20 }
 0x136   : > { %v533_v25 = vpop.permute.xlu1 %532 }
 0x137   : > { %904 = vrot.lane.b32.xlu0 %v2271_v63, %s2867_s28  ;;  %s2870_s28 = smov 30  }
 0x138   : > { %1056 = vperm.xlu1 %1784, %v2070_v27  }
 0x13a   : > { %v2355_v29 = vpop.permute.xlu1 %564 }
 0x13b   : > { %939 = vrot.lane.b32.xlu0 %v2271_v63, %s2856_s18  ;;  %s1897_s18 = smov 14  }
 0x13c   : > { %1785 = vset.pattern.permute.xlu1 %v1896_v53 }
 0x13d   : > { %1148 = vperm.xlu1 %1785, %v2070_v27  }
 0x13f   : > { %956 = vrot.lane.b32.xlu0 %v2292_v36, %s2858_s25  ;;  %s2872_s25 = smov 18  }
 0x141   : > { %1176 = vrot.lane.b32.xlu1 %v2196_v44, %s2870_s28 }
 0x142   : > { %1788 = vset.pattern.permute.xlu1 %v1898_v45  ;;  %v596_v45 = vmul.f32 %v2171_v5, %v2162_v0 }
 0x143   : > { %999 = vrot.lane.b32.xlu0 %v2271_v63, %s2860_s12  ;;  %s2876_s12 = smov 17  }
 0x145   : > { %1191 = vrot.lane.b32.xlu1 %v2079_v32, %s1897_s18  ;;  %v2325_v32 = vpop.permute.xlu0 %1038 }
 0x146   : > { %2877 = vst [vmem:[#allocation30_spill] sm:$0xff] %v2325_v32  ;;  %v519_v32 = vmul.f32 %v2140_v55, %v2162_v0 }
 0x147   : > { %1083 = vrot.lane.b32.xlu0 %v2271_v63, %s2861_s26  ;;  %s2878_s26 = smov 2  }
 0x149   : > { %815 = vrot.lane.b32.xlu1 %v2271_v63, %s2872_s25  ;;  %v2337_v16 = vpop.permute.xlu0 %681  ;;  %s2880_s25 = smov 16  }
 0x14b   : > { %879 = vrot.lane.b32.xlu0 %v2292_v36, %s2874_s29  ;;  %s1902_s29 = smov 94  }
 0x14d   : > { %921 = vrot.lane.b32.xlu1 %v2271_v63, %s2876_s12  ;;  %v2341_v19 = vpop.permute.xlu0 %705 }
 0x14f   : > { %1178 = vrot.lane.b32.xlu0 %v2271_v63, %s2870_s28  ;;  %s2882_s28 = smov 97  }
 0x151   : > { %834 = vrot.lane.b32.xlu1 %v2271_v63, %s2878_s26  ;;  %v2349_v22 = vpop.permute.xlu0 %1130  ;;  %s350_s26 = sand.u32 1, %s1843_s14  }
 0x152   : > { %2883 = vst [vmem:[#allocation33_spill] sm:$0xff] %v2349_v22 }
 0x153   : > { %1193 = vrot.lane.b32.xlu0 %v2196_v44, %s1897_s18 }
 0x155   : > { %860 = vrot.lane.b32.xlu1 %v2292_v36, %s2857_s27  ;;  %s2884_s27 = smov 127   ;;  %v2353_v28 = vpop.permute.xlu0 %976 }
 0x156   : > { %2885 = vst [vmem:[#allocation34_spill] sm:$0xff] %v2353_v28 }
 0x159   : > { %1016 = vrot.lane.b32.xlu1 %v2271_v63, %s2880_s25  ;;  %s1616_s25 = sshll.u32 %s350_s26, 3 }
 0x15d   : > { %1100 = vrot.lane.b32.xlu1 %v2271_v63, %s2855_s21  ;;  %s1899_s21 = smov 126  }
 0x161   : > { %974 = vrot.lane.b32.xlu1 %v2292_v36, %s2882_s28  ;;  %s352_s28 = scalar_lea.vmem [#allocation4], %s1616_s25 }
 0x165   : > { %1117 = vrot.lane.b32.xlu1 %v2292_v36, %s2884_s27 }
 0x16d   : > { %v2357_v30 = vpop.permute.xlu0 %677 }
 0x16e   : > { %v608_v53 = vpop.permute.xlu1 %607 }
 0x16f   : > { %v615_v1 = vadd.f32 %v608_v53, %v596_v45 }
 0x171   : > { %v2361_v24 = vpop.permute.xlu0 %701 }
 0x172   : > { %v629_v10 = vpop.permute.xlu1 %628 }
 0x173   : > { %v639_v23 = vadd.f32 %v629_v10, %v615_v1 }
 0x175   : > { %645 = vrot.lane.b32.xlu1 %v639_v23, %s2884_s27  ;;  %v2364_v22 = vpop.permute.xlu0 %813 }
 0x176   : > { %2886 = vst [vmem:[#allocation35_spill] sm:$0xff] %v2364_v22  ;;  %v535_v35 = vpop.permute.xlu1 %534  ;;  %v597_v22 = vmul.f32 %v2171_v5, %v2184_v37 }
 0x177   : > { %v539_v44 = vsel %vm538_vm6, %v533_v25, %v535_v35 }
 0x178   : > { %v544_v41 = vadd.f32 %v539_v44, %v519_v32 }
 0x179   : > { %v2369_v51 = vpop.permute.xlu0 %919 }
 0x17a   : > { %v561_v18 = vpop.permute.xlu1 %560  ;;  %v923_v25 = vsel %vm764_vm7, %v2209_v52, %v2369_v51 }
 0x17b   : > { %v2371_v45 = vadd.f32 %v561_v18, %v544_v41  ;;  %v927_v61 = vmul.f32 %v923_v25, %v2177_v21 }
 0x17d   : > { %2887 = vst [vmem:[#allocation36_spill] sm:$0xff] %v2371_v45  ;;  %v2373_v17 = vpop.permute.xlu0 %832 }
 0x17e   : > { %2888 = vst [vmem:[#allocation37_spill] sm:$0xff] %v2373_v17  ;;  %v2375_v1 = vpop.permute.xlu1 %796 }
 0x181   : > { %v2377_v23 = vpop.permute.xlu0 %1014 }
 0x182   : > { %v2379_v3 = vpop.permute.xlu1 %902 }
 0x183   : > { %v907_v44 = vsel %vm906_vm8, %v2200_v48, %v2379_v3 }
 0x184   : > { %v911_v41 = vmul.f32 %v907_v44, %v2152_v58 }
 0x185   : > { %v2388_v32 = vpop.permute.xlu0 %1098 }
 0x186   : > { %v2391_v13 = vpop.permute.xlu1 %937  ;;  %v929_v20 = vadd.f32 %v927_v61, %v911_v41  ;;  %v520_v41 = vmul.f32 %v2140_v55, %v2184_v37 }
 0x187   : > { %v942_v12 = vsel %vm941_vm9, %v2249_v50, %v2391_v13  ;;  %v664_v50 = vmul.f32 %v2130_v49, %v2162_v0 }
 0x188   : > { %v946_v52 = vmul.f32 %v942_v12, %v2154_v59 }
 0x189   : > { %v2397_v31 = vpop.permute.xlu0 %972  ;;  %v688_v45 = vadd.f32 %v2357_v30, %v664_v50 }
 0x18a   : > { %2889 = vst [vmem:[#allocation38_spill] sm:$0xff] %v2397_v31  ;;  %v2399_v42 = vadd.f32 %v946_v52, %v929_v20  ;;  %v2401_v48 = vpop.permute.xlu1 %858  ;;  %v598_v52 = vmul.f32 %v2171_v5, %v2251_v14  ;;  %v1757_v5 = vunpack.i.l.bf16 %v2173_v6 }
 0x18b   : > { %2890 = vst [vmem:[#allocation39_spill] sm:$0xff] %v2401_v48  ;;  %v521_v48 = vmul.f32 %v2140_v55, %v2251_v14  ;;  %v712_v15 = vadd.f32 %v2361_v24, %v688_v45 }
 0x18d   : > { %v631_v44 = vpop.permute.xlu0 %630 }
 0x18e   : > { %v2403_v8 = vpop.permute.xlu1 %954  ;;  %v634_v55 = vsel %vm566_vm10, %v629_v10, %v631_v44 }
 0x191   : > { %v2405_v34 = vpop.permute.xlu0 %1115 }
 0x192   : > { %2891 = vst [vmem:[#allocation40_spill] sm:$0xff] %v2405_v34  ;;  %v2407_v25 = vpop.permute.xlu1 %997 }
 0x195   : > { %v2409_v11 = vpop.permute.xlu0 %1119 }
 0x196   : > { %2892 = vst [vmem:[#allocation41_spill] sm:$0xff] %v2409_v11  ;;  %v2411_v17 = vpop.permute.xlu1 %1081  ;;  %v635_v11 = vsel %vm566_vm10, %v631_v44, %v2329_v7 }
 0x199   : > { %v2413_v61 = vpop.permute.xlu0 %1174 }
 0x19a   : > { %v2415_v12 = vpop.permute.xlu1 %877 }
 0x19d   : > { %v537_v20 = vpop.permute.xlu0 %536 }
 0x19e   : > { %v540_v40 = vsel %vm538_vm6, %v535_v35, %v537_v20  ;;  %v610_v57 = vpop.permute.xlu1 %609  ;;  %v546_v28 = vadd.f32 %v537_v20, %v521_v48 }
 0x19f   : > { %v545_v0 = vadd.f32 %v540_v40, %v520_v41  ;;  %v611_v56 = vsel %vm538_vm6, %v608_v53, %v610_v57  ;;  %v617_v26 = vadd.f32 %v610_v57, %v598_v52  ;;  %v2893_v52 = vmov 0  }
 0x1a0   : > { %v616_v34 = vadd.f32 %v611_v56, %v597_v22 }
 0x1a1   : > { %v641_v35 = vadd.f32 %v635_v11, %v617_v26  ;;  %v563_v31 = vpop.permute.xlu0 %562  ;;  %v726_v26 = vmul.f32 %v1757_v5, %v712_v15 }
 0x1a2   : > { %v567_v60 = vsel %vm566_vm10, %v561_v18, %v563_v31  ;;  %v568_v40 = vsel %vm566_vm10, %v563_v31, %v2355_v29  ;;  %v680_v53 = vpop.permute.xlu1 %679  ;;  %v640_v57 = vadd.f32 %v634_v55, %v616_v34  ;;  %v665_v18 = vmul.f32 %v2130_v49, %v2184_v37 }
 0x1a3   : > { %v2438_v50 = vadd.f32 %v567_v60, %v545_v0  ;;  %v2440_v7 = vadd.f32 %v568_v40, %v546_v28  ;;  %v683_v56 = vsel %vm538_vm6, %v2357_v30, %v680_v53  ;;  %v684_v11 = vsel %vm538_vm6, %v680_v53, %v2337_v16  ;;  %649 = vrot.lane.b32.xlu1 %v641_v35, %s2884_s27 }
 0x1a4   : > { %v666_v31 = vmul.f32 %v2130_v49, %v2251_v14  ;;  %647 = vrot.lane.b32.xlu0 %v640_v57, %s2884_s27  ;;  %v1758_v34 = vunpack.i.h.bf16 %v2173_v6  ;;  %v689_v10 = vadd.f32 %v683_v56, %v665_v18  ;;  %s1553_s27 = sshll.u32 %s352_s28, 4  ;;  %s1554_s27 = int_to_ptr.vmem [resolvable:$true] %s1553_s27 }
 0x1a5   : > { %v799_v60 = vpop.permute.xlu0 %798 }
 0x1a6   : > { %v690_v22 = vadd.f32 %v684_v11, %v666_v31  ;;  %v2455_v16 = vsel %vm800_vm11, %v2375_v1, %v799_v60  ;;  %v704_v28 = vpop.permute.xlu1 %703  ;;  %v722_v29 = vsel %vm721_vm12, %v1757_v5, %v1758_v34 }
 0x1a7   : > { %v707_v37 = vsel %vm566_vm10, %v2361_v24, %v704_v28  ;;  %v708_v49 = vsel %vm566_vm10, %v704_v28, %v2341_v19  ;;  %732 = vrot.lane.b32.xlu1 %v726_v26, %s1899_s21 }
 0x1a8   : > { %v713_v6 = vadd.f32 %v707_v37, %v689_v10  ;;  %v714_v14 = vadd.f32 %v708_v49, %v690_v22 }
 0x1a9   : > { %v905_v15 = vpop.permute.xlu0 %904 }
 0x1aa   : > { %v728_v30 = vmul.f32 %v1758_v34, %v714_v14  ;;  %v908_v45 = vsel %vm906_vm8, %v2379_v3, %v905_v15  ;;  %v727_v48 = vmul.f32 %v722_v29, %v713_v6  ;;  %vm651_vm8 = vcmask 1039360  }
 0x1ab   : > { %v912_v28 = vmul.f32 %v908_v45, %v2152_v58 }
 0x1ac   : > { %736 = vrot.lane.b32.xlu1 %v728_v30, %s1899_s21  ;;  %734 = vrot.lane.b32.xlu0 %v727_v48, %s1899_s21 }
 0x1ad   : > { %v940_v24 = vpop.permute.xlu0 %939 }
 0x1ae   : > { %v943_v19 = vsel %vm941_vm9, %v2391_v13, %v940_v24  ;;  %vm581_vm9 = vcmask 908288  }
 0x1af   : > { %v947_v6 = vmul.f32 %v943_v19, %v2154_v59 }
 0x1b0   : > { %1195 = vrot.lane.b32.xlu1 %v2271_v63, %s1897_s18  ;;  %1225 = vperm.xlu0 %1786, %v2070_v27   ;;  %s2894_s18 = smov 111  }
 0x1b1   : > { %v957_v44 = vpop.permute.xlu0 %956 }
 0x1b2   : > { %v960_v20 = vsel %vm721_vm12, %v2403_v8, %v957_v44  ;;  %v961_v49 = vsel %vm721_vm12, %v957_v44, %v2286_v33  ;;  %v1086_v44 = vsel %vm1085_vm14, %v2309_v43, %v2411_v17  ;;  %vm738_vm12 = vcmask 1031168  }
 0x1b3   : > { %v964_v3 = vmul.f32 %v960_v20, %v2158_v62  ;;  %v2475_v41 = vpop.permute.xlu1 %1056  ;;  %v965_v58 = vmul.f32 %v961_v49, %v2158_v62 }
 0x1b4   : > { %1041 = vrot.lane.b32.xlu1 %v2227_v4, %s1888_s30  ;;  %1787 = vset.pattern.permute.xlu0 %v2893_v52 }
 0x1b5   : > { %v2481_v13 = vadd.f32 %v964_v3, %v2399_v42  ;;  %785 = vperm.xlu0 %1787, %v2070_v27   ;;  %v1000_v0 = vpop.permute.xlu0 %999 }
 0x1b6   : > { %v1003_v55 = vsel %vm1001_vm13, %v2407_v25, %v1000_v0  ;;  %v2895_v0 = vld [vmem:[#allocation29_spill] sm:$0xff] }
 0x1b7   : > { %v1007_v62 = vmul.f32 %v1003_v55, %v2215_v54  ;;  %v1103_v55 = vsel %vm1102_vm4, %v2895_v0, %v2388_v32 }
 0x1b8   : > { %1043 = vrot.lane.b32.xlu1 %v2292_v36, %s1888_s30  ;;  %v2488_v8 = vpop.permute.xlu1 %1148  ;;  %v1107_v43 = vmul.f32 %v1103_v55, %v2233_v9 }
 0x1b9   : > { %1045 = vrot.lane.b32.xlu0 %v2099_v39, %s1888_s30  ;;  %v1084_v35 = vpop.permute.xlu0 %1083  ;;  %s1900_s30 = smov 95  }
 0x1ba   : > { %v1087_v42 = vsel %vm1085_vm14, %v2411_v17, %v1084_v35  ;;  %v2896_v35 = vld [vmem:[#allocation38_spill] sm:$0xff]  ;;  %vm817_vm14 = vcmask 146432  }
 0x1bb   : > { %v1091_v24 = vmul.f32 %v1087_v42, %v2273_v46  ;;  %v1090_v42 = vmul.f32 %v1086_v44, %v2273_v46  ;;  %v2899_v46 = vld [vmem:[#allocation40_spill] sm:$0xff] }
 0x1bc   : > { %1133 = vrot.lane.b32.xlu1 %v2227_v4, %s2894_s18  ;;  %v1177_v5 = vpop.permute.xlu1 %1176 }
 0x1bd   : > { %v1181_v40 = vsel %vm1180_vm15, %v2413_v61, %v1177_v5  ;;  %1135 = vrot.lane.b32.xlu0 %v2292_v36, %s2894_s18  ;;  %v2499_v53 = vpop.permute.xlu0 %879 }
 0x1be   : > { %v2504_v57 = vsel %vm883_vm1, %v2415_v12, %v2499_v53  ;;  %v1185_v34 = vmul.f32 %v1181_v40, %v2279_v47  ;;  %v2897_v40 = vld [vmem:[#allocation34_spill] sm:$0xff] }
 0x1c0   : > { %1137 = vrot.lane.b32.xlu1 %v2099_v39, %s2894_s18  ;;  %v1192_v56 = vpop.permute.xlu1 %1191 }
 0x1c1   : > { %1210 = vrot.lane.b32.xlu0 %v2227_v4, %s1899_s21  ;;  %v1179_v11 = vpop.permute.xlu0 %1178 }
 0x1c2   : > { %v2510_v18 = vsel %vm1180_vm15, %v1177_v5, %v1179_v11  ;;  %v2898_v11 = vld [vmem:[#allocation22_spill] sm:$0xff]  ;;  %vm836_vm15 = vcmask 15360  }
 0x1c4   : > { %1212 = vrot.lane.b32.xlu1 %v2292_v36, %s1899_s21  ;;  %v2514_v61 = vpop.permute.xlu1 %815 }
 0x1c5   : > { %1214 = vrot.lane.b32.xlu0 %v2099_v39, %s1899_s21  ;;  %v2518_v12 = vpop.permute.xlu0 %1193 }
 0x1c6   : > { %v1198_v31 = vsel %vm1197_vm2, %v1192_v56, %v2518_v12 }
 0x1c7   : > { %v1202_v26 = vmul.f32 %v1198_v31, %v2295_v38 }
 0x1c8   : > { %1244 = vperm.xlu1 %1788, %v2070_v27   ;;  %v922_v60 = vpop.permute.xlu1 %921 }
 0x1c9   : > { %v2525_v10 = vadd.f32 %v1202_v26, %v1185_v34  ;;  %v924_v22 = vsel %vm764_vm7, %v2369_v51, %v922_v60  ;;  %1059 = vrot.lane.b32.xlu0 %v2227_v4, %s2864_s20  ;;  %v2900_v60 = vld [vmem:[#allocation41_spill] sm:$0xff] }
 0x1ca   : > { %v928_v37 = vmul.f32 %v924_v22, %v2177_v21 }
 0x1cc   : > { %v930_v14 = vadd.f32 %v928_v37, %v912_v28  ;;  %1061 = vrot.lane.b32.xlu1 %v2292_v36, %s2864_s20  ;;  %v2538_v27 = vpop.permute.xlu1 %834  ;;  %v1109_v28 = vadd.f32 %v1107_v43, %v1090_v42  ;;  %v2901_v37 = vld [vmem:[#allocation23_spill] sm:$0xff]  ;;  %v2904_v42 = vld [vmem:[#allocation14_spill] sm:$0xff] }
 0x1cd   : > { %1063 = vrot.lane.b32.xlu0 %v2099_v39, %s2864_s20  ;;  %1789 = vset.pattern.permute.xlu1 %v2893_v52  ;;  %s1901_s20 = smov 110  }
 0x1ce   : > { %v949_v51 = vadd.f32 %v947_v6, %v930_v14 }
 0x1d0   : > { %1151 = vrot.lane.b32.xlu1 %v2227_v4, %s1900_s30  ;;  %v2545_v21 = vpop.permute.xlu1 %860  ;;  %v967_v59 = vadd.f32 %v965_v58, %v949_v51 }
 0x1d1   : > { %1153 = vrot.lane.b32.xlu0 %v2292_v36, %s1900_s30 }
 0x1d4   : > { %1155 = vrot.lane.b32.xlu1 %v2099_v39, %s1900_s30  ;;  %v1017_v33 = vpop.permute.xlu1 %1016  ;;  %s1539_s30 = scalar_lea.sflag [#allocation5], %s350_s26 }
 0x1d5   : > { %v1020_v15 = vsel %vm1018_vm3, %v2377_v23, %v1017_v33  ;;  %1228 = vrot.lane.b32.xlu0 %v2227_v4, %s1901_s20 }
 0x1d6   : > { %v1024_v29 = vmul.f32 %v1020_v15, %v2221_v2 }
 0x1d8   : > { %v2554_v30 = vadd.f32 %v1024_v29, %v1007_v62  ;;  %1230 = vrot.lane.b32.xlu1 %v2292_v36, %s1901_s20  ;;  %v1101_v45 = vpop.permute.xlu1 %1100 }
 0x1d9   : > { %v1104_v48 = vsel %vm1102_vm4, %v2388_v32, %v1101_v45  ;;  %1232 = vrot.lane.b32.xlu0 %v2099_v39, %s1901_s20  ;;  %v2903_v45 = vld [vmem:[#allocation36_spill] sm:$0xff]  ;;  %vm864_vm4 = vcmask 932864   ;;  %s1791_s20 = scalar_lea.vmem %s1554_s27, 128 }
 0x1da   : > { %v1108_v19 = vmul.f32 %v1104_v48, %v2233_v9  ;;  %p1792_p11 = scmp.ne.s32.totalorder %s1554_s27, %s1791_s20 }
 0x1dc   : > { %v1110_v20 = vadd.f32 %v1108_v19, %v1091_v24  ;;  %1247 = vrot.lane.b32.xlu1 %v2227_v4, %s1902_s29  ;;  %v975_v3 = vpop.permute.xlu1 %974  ;;  %v779_v4 = vld [vmem:[%s2777_s5 + $0x4] sm:$0xf]  ;;  %p1793_p12 = pnand %p1792_p11, %p1998_p5 }
 0x1dd   : > { %v979_v5 = vsel %vm978_vm5, %v2896_v35, %v975_v3  ;;  %v980_v56 = vsel %vm978_vm5, %v975_v3, %v2897_v40  ;;  %1249 = vrot.lane.b32.xlu0 %v2292_v36, %s1902_s29 }
 0x1de   : > { %v983_v31 = vmul.f32 %v979_v5, %v2898_v11  ;;  %v984_v17 = vmul.f32 %v980_v56, %v2898_v11  ;;  %p1794_p13 = pneg %p1793_p12 }
 0x1e0   : > { %v2578_v32 = vadd.f32 %v983_v31, %v2481_v13  ;;  %v2580_v34 = vadd.f32 %v984_v17, %v967_v59  ;;  %v1118_v26 = vpop.permute.xlu1 %1117  ;;  %1251 = vrot.lane.b32.xlu1 %v2099_v39, %s1902_s29  ;;  %v2902_v39 = vld [vmem:[#allocation13_spill] sm:$0xff]  ;;  %s1904_s29 = smov [#allocation4]  }
 0x1e1   : > { %v1121_v36 = vsel %vm651_vm8, %v2899_v46, %v1118_v26  ;;  %v1122_v22 = vsel %vm651_vm8, %v1118_v26, %v2900_v60  ;;  %1268 = vperm.xlu0 %1787, %v779_v4   ;;  %v1763_v59 = vunpack.i.h.bf16 %v2902_v39  ;;  %v1762_v33 = vunpack.i.l.bf16 %v2902_v39  ;;  %v2906_v60 = vld [vmem:[#allocation19_spill] sm:$0xff] }
 0x1e2   : > { %v1125_v49 = vmul.f32 %v1121_v36, %v2901_v37  ;;  %v1126_v9 = vmul.f32 %v1122_v22, %v2901_v37  ;;  %v2905_v36 = vld [vmem:[#allocation35_spill] sm:$0xff]  ;;  %v2907_v37 = vld [vmem:[#allocation37_spill] sm:$0xff] }
 0x1e3   : > { %v588_v62 = vmul.f32 %v1763_v59, %v2440_v7  ;;  %v586_v48 = vmul.f32 %v1762_v33, %v2903_v45  ;;  %v582_v19 = vsel %vm581_vm9, %v1762_v33, %v1763_v59  ;;  %v818_v22 = vsel %vm817_vm14, %v2906_v60, %v2905_v36  ;;  %v2910_v59 = vld [vmem:[#allocation16_spill] sm:$0xff] }
 0x1e4   : > { %v2589_v6 = vadd.f32 %v1125_v49, %v1109_v28  ;;  %v2591_v13 = vadd.f32 %v1126_v9, %v1110_v20  ;;  %v587_v20 = vmul.f32 %v582_v19, %v2438_v50  ;;  %v819_v28 = vsel %vm817_vm14, %v2905_v36, %v2514_v61  ;;  %v2908_v49 = vld [vmem:[#allocation21_spill] sm:$0xff] }
 0x1e5   : > { %v837_v9 = vsel %vm836_vm15, %v2908_v49, %v2907_v37  ;;  %v822_v33 = vmul.f32 %v818_v22, %v2910_v59  ;;  %v2913_v19 = vld [vmem:[#allocation17_spill] sm:$0xff] }
 0x1e7   : > { %v646_v14 = vpop.permute.xlu1 %645 }
 0x215   : > { %v650_v58 = vpop.permute.xlu1 %649 }
 0x216   : > { %v648_v51 = vpop.permute.xlu0 %647  ;;  %v659_v24 = vadd.f32 %v650_v58, %v588_v62 }
 0x217   : > { %v652_v29 = vsel %vm651_vm8, %v646_v14, %v648_v51  ;;  %v653_v44 = vsel %vm651_vm8, %v648_v51, %v650_v58  ;;  %v2909_v14 = vld [vmem:[#allocation18_spill] sm:$0xff]  ;;  %v838_v51 = vsel %vm836_vm15, %v2907_v37, %v2538_v27  ;;  %vm1903_vm8 = vmmov 0  }
 0x218   : > { %v657_v3 = vadd.f32 %v652_v29, %v586_v48  ;;  %v658_v40 = vadd.f32 %v653_v44, %v587_v20  ;;  %v801_v58 = vsel %vm800_vm11, %v2909_v14, %v2375_v1  ;;  %v2911_v29 = vld [vmem:[#allocation39_spill] sm:$0xff]  ;;  %v841_v1 = vmul.f32 %v837_v9, %v2913_v19  ;;  %v2919_v14 = vld [vmem:[#allocation9_spill] sm:$0xff] }
 0x219   : > { %v733_v15 = vpop.permute.xlu1 %732  ;;  %v865_v45 = vsel %vm864_vm4, %v2911_v29, %v2545_v21  ;;  %v2912_v48 = vld [vmem:[#allocation27_spill] sm:$0xff]  ;;  %v842_v44 = vmul.f32 %v838_v51, %v2913_v19  ;;  %v2920_v51 = vld [vmem:[#allocation10_spill] sm:$0xff] }
 0x21e   : > { %v735_v0 = vpop.permute.xlu0 %734  ;;  %v737_v55 = vpop.permute.xlu1 %736 }
 0x21f   : > { %v739_v35 = vsel %vm738_vm12, %v733_v15, %v735_v0  ;;  %v740_v5 = vsel %vm738_vm12, %v735_v0, %v737_v55  ;;  %v746_v7 = vadd.f32 %v737_v55, %v659_v24  ;;  %v823_v15 = vmul.f32 %v819_v28, %v2910_v59  ;;  %v2914_v0 = vld [vmem:[#allocation32_spill] sm:$0xff] }
 0x220   : > { %v744_v56 = vadd.f32 %v739_v35, %v657_v3  ;;  %v745_v17 = vadd.f32 %v740_v5, %v658_v40  ;;  %v866_v24 = vsel %vm864_vm4, %v2545_v21, %v2912_v48  ;;  %v885_v55 = vsel %vm883_vm1, %v2499_v53, %v2914_v0  ;;  %v2915_v5 = vld [vmem:[#allocation7_spill] sm:$0xff]  ;;  %v2645_v53 = vld [vmem:[#allocation2 + $0x8] sm:$0xff] }
 0x221   : > { %v754_v11 = vadd.f32 %v2904_v42, %v746_v7  ;;  %vm469_vm11 = vcmp.ge.s32.totalorder %v2915_v5, 2  ;;  %v2917_v7 = vld [vmem:[#allocation15_spill] sm:$0xff]  ;;  %v2923_v0 = vld [vmem:[#allocation20_spill] sm:$0xff]  ;;  %vm501_vm1 = vcmp.lt.s32.totalorder %v2915_v5, 14  ;;  %1648 = vmatprep.mubr.msk.f32.mxu0 %vm1903_vm8, %v2645_v53  ;;  %1653 = vmatprep.mubr.msk.f32.mxu1 %vm1903_vm8, %v2645_v53 }
 0x222   : > { %v752_v31 = vadd.f32 %v2904_v42, %v744_v56  ;;  %v2605_v4 = vpop.permute.xlu1 %1195  ;;  %v753_v50 = vadd.f32 %v2904_v42, %v745_v17  ;;  %v869_v40 = vmul.f32 %v865_v45, %v2917_v7  ;;  %v870_v21 = vmul.f32 %v866_v24, %v2917_v7  ;;  %v2922_v45 = vld [vmem:[#allocation26_spill] sm:$0xff] }
 0x223   : > { %762 = vrot.lane.b32.xlu0 %v754_v11, %s2876_s12  ;;  %v2918_v11 = vld [vmem:[#allocation24_spill] sm:$0xff]  ;;  %v1622_v22 = vsel %vm469_vm11, 1.0, %v2645_v53  ;;  %v1019_v48 = vsel %vm1018_vm3, %v2922_v45, %v2377_v23  ;;  %vm769_vm3 = vcmask 1043456  }
 0x224   : > { %758 = vrot.lane.b32.xlu1 %v752_v31, %s2876_s12  ;;  %v888_v31 = vmul.f32 %v2504_v57, %v2918_v11  ;;  %v889_v17 = vmul.f32 %v885_v55, %v2918_v11  ;;  %v988_v57 = vmul.f32 %v2920_v51, %v2580_v34  ;;  %v2924_v55 = vld [vmem:[#allocation25_spill] sm:$0xff] }
 0x225   : > { %v1033_v7 = vmul.f32 %v2924_v55, %v2923_v0 }
 0x226   : > { %v1042_v43 = vpop.permute.xlu1 %1041 }
 0x228   : > { %760 = vrot.lane.b32.xlu1 %v753_v50, %s2876_s12  ;;  %s1641_s12 = sshll.u32 %s1981_s17, 7  ;;  %s1795_s17 = sshll.u32 %s1904_s29, 4  ;;  %s1796_s17 = int_to_ptr.vmem [resolvable:$false] %s1795_s17 }
 0x229   : > { %s1551_s18 = scalar_lea.hbm %s2782_s10, %s1641_s12  ;;  %s1797_s25 = scalar_lea.vmem %s1796_s17, 256 }
 0x22a   : > { %v1044_v46 = vpop.permute.xlu1 %1043  ;;  %p1798_p0 = scmp.lt.s32.totalorder %s1554_s27, %s1796_s17  ;;  %p1799_p1 = scmp.lt.s32.totalorder %s1797_s25, %s1791_s20 }
 0x22b   : > { %v2611_v26 = vpop.permute.xlu0 %1225  ;;  %v1047_v34 = vsel %vm538_vm6, %v1042_v43, %v1044_v46 }
 0x22c   : > { %p1800_p2 = por %p1799_p1, %p1798_p0 }
 0x22e   : > { %v1134_v20 = vpop.permute.xlu1 %1133  ;;  %p1801_p3 = pnand %p1800_p2, %p1794_p13 }
 0x230   : > { %v786_v39 = vpop.permute.xlu0 %785 }
 0x231   : > { %v805_v62 = vmul.f32 %v801_v58, %v786_v39  ;;  %v806_v61 = vmul.f32 %v2455_v16, %v786_v39  ;;  %v2916_v16 = vld [vmem:[#allocation8_spill] sm:$0xff]  ;;  %v987_v58 = vmul.f32 %v2919_v14, %v2578_v32 }
 0x232   : > { %vm470_vm5 = vcmp.ge.s32.totalorder %v2916_v16, 2  ;;  %v1138_v9 = vpop.permute.xlu1 %1137 }
 0x233   : > { %v824_v27 = vadd.f32 %v822_v33, %v805_v62  ;;  %v825_v3 = vadd.f32 %v823_v15, %v806_v61  ;;  %v1623_v28 = vsel %vm470_vm5, 1.0, %v2645_v53  ;;  %v2921_v33 = vld [vmem:[#allocation28_spill] sm:$0xff] }
 0x234   : > { %v1046_v35 = vpop.permute.xlu0 %1045  ;;  %v1002_v15 = vsel %vm1001_vm13, %v2921_v33, %v2407_v25  ;;  %vm1253_vm13 = vcmask 769024  }
 0x235   : > { %v843_v56 = vadd.f32 %v841_v1, %v824_v27  ;;  %v844_v42 = vadd.f32 %v842_v44, %v825_v3  ;;  %v1006_v24 = vmul.f32 %v1002_v15, %v2215_v54  ;;  %v1023_v1 = vmul.f32 %v1019_v48, %v2221_v2 }
 0x236   : > { %v1213_v19 = vpop.permute.xlu1 %1212  ;;  %v1048_v27 = vsel %vm538_vm6, %v1044_v46, %v1046_v35  ;;  %v1034_v54 = vmul.f32 %v2924_v55, %v2271_v63  ;;  %vm1157_vm6 = vcmask 777216   ;;  %v2929_v55 = vld [vmem:[#allocation12_spill] sm:$0xff] }
 0x237   : > { %v871_v50 = vadd.f32 %v869_v40, %v843_v56  ;;  %v872_v36 = vadd.f32 %v870_v21, %v844_v42  ;;  %v1025_v44 = vadd.f32 %v1023_v1, %v1006_v24  ;;  %v2925_v40 = vld [vmem:[#allocation30_spill] sm:$0xff] }
 0x238   : > { %v1136_v60 = vpop.permute.xlu0 %1135  ;;  %v1051_v21 = vmul.f32 %v1047_v34, %v2925_v40  ;;  %v1052_v23 = vmul.f32 %v1048_v27, %v2925_v40  ;;  %v1036_v42 = vadd.f32 %v1034_v54, %v2554_v30  ;;  %v2928_v34 = vld [vmem:[#allocation31_spill] sm:$0xff] }
 0x239   : > { %v890_v37 = vadd.f32 %v888_v31, %v871_v50  ;;  %v891_v49 = vadd.f32 %v889_v17, %v872_v36  ;;  %v1035_v56 = vadd.f32 %v1033_v7, %v1025_v44  ;;  %v1139_v2 = vsel %vm581_vm9, %v1134_v20, %v1136_v60  ;;  %v2926_v36 = vld [vmem:[#allocation33_spill] sm:$0xff] }
 0x23a   : > { %v1054_v50 = vadd.f32 %v1052_v23, %v1036_v42  ;;  %v1140_v63 = vsel %vm581_vm9, %v1136_v60, %v1138_v9 }
 0x23b   : > { %v892_v39 = vmul.f32 %v1622_v22, %v890_v37  ;;  %v893_v59 = vmul.f32 %v1623_v28, %v891_v49  ;;  %v1053_v11 = vadd.f32 %v1051_v21, %v1035_v56  ;;  %v1143_v22 = vmul.f32 %v1139_v2, %v2926_v36 }
 0x23c   : > { %v1211_v62 = vpop.permute.xlu0 %1210  ;;  %v1144_v14 = vmul.f32 %v1140_v63, %v2926_v36 }
 0x23d   : > { %v989_v61 = vadd.f32 %v987_v58, %v892_v39  ;;  %v990_v29 = vadd.f32 %v988_v57, %v893_v59  ;;  %v1145_v57 = vadd.f32 %v1143_v22, %v2589_v6  ;;  %v1216_v45 = vsel %vm738_vm12, %v1211_v62, %v1213_v19  ;;  %v2927_v6 = vld [vmem:[#allocation11_spill] sm:$0xff] }
 0x23e   : > { %v1220_v44 = vmul.f32 %v1216_v45, %v2928_v34 }
 0x240   : > { %v1215_v32 = vpop.permute.xlu0 %1214 }
 0x241   : > { %v1217_v27 = vsel %vm738_vm12, %v1213_v19, %v1215_v32  ;;  %v1222_v19 = vadd.f32 %v1220_v44, %v2525_v10 }
 0x243   : > { %v2663_v3 = vpop.permute.xlu1 %1244 }
 0x244   : > { %v1060_v25 = vpop.permute.xlu0 %1059 }
 0x247   : > { %v1062_v43 = vpop.permute.xlu1 %1061 }
 0x248   : > { %v1065_v46 = vsel %vm566_vm10, %v1060_v25, %v1062_v43  ;;  %v1064_v35 = vpop.permute.xlu0 %1063 }
 0x249   : > { %v1069_v31 = vmul.f32 %v1065_v46, %v2475_v41  ;;  %v1066_v17 = vsel %vm566_vm10, %v1062_v43, %v1064_v35  ;;  %vm1234_vm10 = vcmask 900096  }
 0x24a   : > { %v1070_v28 = vmul.f32 %v1066_v17, %v2475_v41  ;;  %v1146_v41 = vadd.f32 %v1144_v14, %v2591_v13 }
 0x24b   : > { %v1071_v20 = vadd.f32 %v1069_v31, %v1053_v11  ;;  %v1152_v37 = vpop.permute.xlu1 %1151 }
 0x24c   : > { %v1072_v49 = vadd.f32 %v1070_v28, %v1054_v50  ;;  %v1154_v30 = vpop.permute.xlu0 %1153 }
 0x24d   : > { %v1073_v58 = vadd.f32 %v1071_v20, %v989_v61  ;;  %v1158_v51 = vsel %vm1157_vm6, %v1152_v37, %v1154_v30  ;;  %v1199_v61 = vsel %vm1197_vm2, %v2518_v12, %v2605_v4  ;;  %v1186_v12 = vmul.f32 %v2510_v18, %v2279_v47 }
 0x24e   : > { %v1074_v39 = vadd.f32 %v1072_v49, %v990_v29  ;;  %v1162_v59 = vmul.f32 %v1158_v51, %v2488_v8  ;;  %v1203_v62 = vmul.f32 %v1199_v61, %v2295_v38  ;;  %v1221_v4 = vmul.f32 %v1217_v27, %v2928_v34 }
 0x24f   : > { %v1156_v33 = vpop.permute.xlu1 %1155  ;;  %vm502_vm2 = vcmp.lt.s32.totalorder %v2916_v16, 14  ;;  %v1628_v47 = vsel %vm501_vm1, 1.0, %v2645_v53 }
 0x250   : > { %v1164_v60 = vadd.f32 %v1162_v59, %v1145_v57  ;;  %v1159_v9 = vsel %vm1157_vm6, %v1154_v30, %v1156_v33  ;;  %v1229_v15 = vpop.permute.xlu0 %1228  ;;  %v1205_v23 = vadd.f32 %v1203_v62, %v1186_v12  ;;  %v1629_v11 = vsel %vm502_vm2, 1.0, %v2645_v53  ;;  %v1368_v53 = vld [vmem:[%s2779_s7] sm:$0xff] }
 0x251   : > { %v1163_v48 = vmul.f32 %v1159_v9, %v2488_v8 }
 0x252   : > { %v1166_v29 = vmul.f32 %v2927_v6, %v1164_v60  ;;  %v1223_v42 = vadd.f32 %v1221_v4, %v1205_v23 }
 0x253   : > { %v1165_v24 = vadd.f32 %v1163_v48, %v1146_v41  ;;  %v1231_v1 = vpop.permute.xlu1 %1230  ;;  %v1292_v48 = vld [vmem:[%s2778_s6] sm:$0x3] }
 0x254   : > { %v1235_v25 = vsel %vm1234_vm10, %v1229_v15, %v1231_v1  ;;  %v1233_v0 = vpop.permute.xlu0 %1232  ;;  %v1168_v13 = vadd.f32 %v1166_v29, %v1073_v58 }
 0x255   : > { %v1167_v8 = vmul.f32 %v2929_v55, %v1165_v24  ;;  %v1239_v7 = vmul.f32 %v1235_v25, %v2611_v26  ;;  %v1236_v40 = vsel %vm1234_vm10, %v1231_v1, %v1233_v0  ;;  %v1470_v0 = vld [vmem:[%s2781_s9] sm:$0xf] }
 0x256   : > { %v1240_v38 = vmul.f32 %v1236_v40, %v2611_v26 }
 0x257   : > { %v1248_v21 = vpop.permute.xlu1 %1247  ;;  %v1169_v54 = vadd.f32 %v1167_v8, %v1074_v39  ;;  %v1241_v2 = vadd.f32 %v1239_v7, %v1222_v19 }
 0x258   : > { %v1250_v32 = vpop.permute.xlu0 %1249  ;;  %v1242_v35 = vadd.f32 %v1240_v38, %v1223_v42  ;;  %v1467_v42 = vld [vmem:[%s2780_s8] sm:$0x3] }
 0x259   : > { %v1254_v56 = vsel %vm1253_vm13, %v1248_v21, %v1250_v32 }
 0x25a   : > { %v1258_v43 = vmul.f32 %v1254_v56, %v2663_v3 }
 0x25b   : > { %v1252_v46 = vpop.permute.xlu1 %1251 }
 0x25c   : > { %v1260_v18 = vadd.f32 %v1258_v43, %v1241_v2  ;;  %v1255_v10 = vsel %vm1253_vm13, %v1250_v32, %v1252_v46  ;;  %v1269_v17 = vpop.permute.xlu0 %1268  ;;  %v1526_v46 = vld [vmem:[%s2022_s11] sm:$0xf] }
 0x25d   : > { %v1259_v5 = vmul.f32 %v1255_v10, %v2663_v3 }
 0x25e   : > { %v1262_v26 = vmul.f32 %v1628_v47, %v1260_v18  ;;  %v1527_v47 = vunpack.c.l.bf16 %v1526_v46 }
 0x25f   : > { %v1261_v31 = vadd.f32 %v1259_v5, %v1242_v35 }
 0x260   : > { %v1264_v50 = vadd.f32 %v1262_v26, %v1168_v13  ;;  %v1529_v35 = vcombine.high %v1527_v47, %v1527_v47 }
 0x261   : > { %v1263_v63 = vmul.f32 %v1629_v11, %v1261_v31 }
 0x262   : > { %v1271_v36 = vadd.f32 %v1269_v17, %v1264_v50 }
 0x263   : > { %v1265_v22 = vadd.f32 %v1263_v63, %v1169_v54 }
 0x264   : > { %v1281_v28 = vrot.slane %v1271_v36, 4  ;;  %v1273_v20 = vsel %vm769_vm3, %v1271_v36, 0.0 }
 0x265   : > { %v1272_v16 = vadd.f32 %v1269_v17, %v1265_v22 }
 0x266   : > { %1285 = vst [vmem:[#allocation3] sm:$0xf0] %v1281_v28 }
 0x267   : > { %v1274_v37 = vsel %vm769_vm3, %v1272_v16, 0.0  ;;  %v1282_v49 = vrot.slane %v1272_v16, 4 }
 0x268   : > { %v1275_v30 = vadd.f32 %v1274_v37, %v1273_v20 }
 0x269   : > { %1286 = vst [vmem:[#allocation3 + $0x8] sm:$0xf0] %v1282_v49 }
 0x26a   : > { %1276 = vadd.xlane.f32.xlu1 %v1275_v30 }
 0x27b   : > { %1473 = vperm.xlu1 %1789, %v1470_v0  }
 0x295   : > { %v763_v14 = vpop.permute.xlu0 %762 }
 0x296   : > { %v759_v3 = vpop.permute.xlu1 %758 }
 0x29a   : > { %v761_v58 = vpop.permute.xlu1 %760 }
 0x29b   : > { %v765_v51 = vsel %vm764_vm7, %v759_v3, %v761_v58  ;;  %v766_v57 = vsel %vm764_vm7, %v761_v58, %v763_v14  ;;  %vm1293_vm7 = vcmask 64512  }
 0x29c   : > { %v770_v39 = vsel %vm769_vm3, %v765_v51, 0.0  ;;  %v771_v59 = vsel %vm769_vm3, %v766_v57, 0.0  ;;  %776 = vst [vmem:[#allocation3] sm:$0xf] %v765_v51  ;;  %777 = vst [vmem:[#allocation3 + $0x8] sm:$0xf] %v766_v57 }
 0x29d   : > { %v772_v33 = vadd.f32 %v771_v59, %v770_v39 }
 0x29f   : > { %773 = vadd.xlane.f32.xlu0 %v772_v33 }
 0x2a3   : > { %v1448_v13 = vld [vmem:[#allocation3] sm:$0xff]  ;;  %v1449_v62 = vld [vmem:[#allocation3 + $0x8] sm:$0xff] }
 0x2f3   : > { %v1277_v60 = vpop.xlane.xlu1 %1276 }
 0x2f4   : > { %v1288_v9 = vrot.slane %v1277_v60, 4 }
 0x2f7   : > { %v1474_v18 = vpop.permute.xlu1 %1473 }
 0x328   : > { %v774_v15 = vpop.xlane.xlu0 %773 }
 0x329   : > { %v1290_v41 = vsel %vm769_vm3, %v774_v15, %v1288_v9 }
 0x32a   : > { %v1291_v45 = vmul.f32 0.00390625, %v1290_v41 }
 0x32c   : > { %1647 = vmatpush3.msra.mxu0 %v1291_v45 }
 0x32d   : > { %1649 = vmatmul.mubr.msk.f32.vlgmr.msra.gmra.mxu0 %vm1293_vm7, %v1292_v48 }
 0x3ed   : > { %v1363_v61 = vpop.f32.mrf.mxu0 }
 0x3ee   : > { %v1367_v6 = vmax.f32 %v1363_v61, 0.0 }
 0x3ef   : > { %v1650_v29 = vpop.f32.mrf.mxu0 }
 0x3f0   : > { %1652 = vmatpush3.msk.msra.mxu1 %vm380_vm0, %v1367_v6 }
 0x3f1   : > { %1654 = vmatmul.mubr.msk.f32.vlgmr.msra.gmra.mxu1 %vm836_vm15, %v1368_v53 }
 0x3f2   : > { %1517 = vmatprep.mubr.bf16.mxu1 %v2893_v52 }
 0x4b1   : > { %v1441_v24 = vpop.f32.mrf.mxu1 }
 0x4b2   : > { %v1442_v1 = vadd.f32 3.0, %v1441_v24 }
 0x4b3   : > { %v1655_v34 = vpop.f32.mrf.mxu1 }
 0x4b4   : > { %v1445_v44 = vmax.f32 %v1442_v1, 0.0 }
 0x4b6   : > { %v1446_v27 = vmin.f32 %v1445_v44, 6.0 }
 0x4b8   : > { %v1447_v25 = vmul.f32 0.16666667, %v1446_v27 }
 0x4ba   : > { %1452 = vperm.xlu0 %1787, %v1447_v25  }
 0x535   : > { %v1453_v55 = vpop.permute.xlu0 %1452 }
 0x536   : > { %v1455_v8 = vmul.f32 %v1453_v55, %v1448_v13  ;;  %v1456_v7 = vmul.f32 %v1453_v55, %v1449_v62 }
 0x538   : > { %v1457_v40 = vadd.f32 3.0, %v1455_v8  ;;  %v1458_v12 = vadd.f32 3.0, %v1456_v7 }
 0x53a   : > { %v1459_v52 = vmax.f32 %v1457_v40, 0.0  ;;  %v1460_v4 = vmax.f32 %v1458_v12, 0.0 }
 0x53c   : > { %v1461_v21 = vmin.f32 %v1459_v52, 6.0  ;;  %v1462_v54 = vmin.f32 %v1460_v4, 6.0 }
 0x53e   : > { %v1463_v19 = vmul.f32 %v1461_v21, %v1455_v8  ;;  %v1464_v32 = vmul.f32 %v1462_v54, %v1456_v7 }
 0x540   : > { %v1465_v23 = vmul.f32 0.16666667, %v1463_v19  ;;  %v1466_v38 = vmul.f32 0.16666667, %v1464_v32 }
 0x542   : > { %v1468_v56 = vpack.c.bf16 %v1465_v23, %v1465_v23  ;;  %v1469_v2 = vpack.c.bf16 %v1466_v38, %v1466_v38 }
 0x544   : > { %1633 = vmatprep.subr.msk.bf16.mxu1 %vm769_vm3, %v1469_v2  ;;  %v1480_v43 = vsel %vm769_vm3, %v1468_v56, 0 }
 0x545   : > { %1500 = vmatpush1.bf16.msra.mxu1 %v1480_v43 }
 0x548   : > { %1634 = vmatmul.mubr.msk.bf16.vlgmr.msra.gmra.mxu1 %vm1293_vm7, %v1467_v42 }
 0x608   : > { %v1519_v10 = vpop.f32.mrf.mxu1 }
 0x609   : > { %v1520_v5 = vadd.f32 %v1519_v10, %v1474_v18 }
 0x60a   : > { %v1521_v11 = vpop.f32.mrf.mxu1 }
 0x60b   : > { %v1522_v26 = vadd.f32 %v1521_v11, %v1474_v18  ;;  %v1531_v17 = vadd.f32 %v1527_v47, %v1520_v5 }
 0x60c   : > { %v1523_v31 = vpop.f32.mrf.mxu1 }
 0x60d   : > { %v1532_v50 = vadd.f32 %v1529_v35, %v1522_v26 }
 0x60e   : > { %v1524_v63 = vpop.f32.mrf.mxu1 }
 0x60f   : > { %v1535_v36 = vcombine.low %v1531_v17, %v1532_v50 }
 0x611   : > { %1537 = vst [vmem:[%s352_s28] sm:$0xff] %v1535_v36 }
 0x612   : > { %1804 = shalt.err (!%p1801_p3)
}
 0x613   : > { %s1805_s0 = scalar_lea.hbm %s1551_s18, 128  ;;  %s1809_s28 = scalar_lea.hbm %s2782_s10, 256 }
 0x614   : > { %p1806_p4 = scmp.ne.s32.totalorder %s1551_s18, %s1805_s0  ;;  %p1810_p9 = scmp.lt.s32.totalorder %s1551_s18, %s2782_s10 }
 0x615   : > { %p1811_p10 = scmp.lt.s32.totalorder %s1809_s28, %s1805_s0 }
 0x616   : > { %p1807_p7 = pnand %p1806_p4, %p1998_p5 }
 0x617   : > { %p1812_p11 = por %p1811_p10, %p1810_p9 }
 0x618   : > { %p1808_p8 = pneg %p1807_p7 }
 0x61a   : > { %p1813_p12 = pnand %p1812_p11, %p1808_p8 }
 0x61c   : > { %1816 = shalt.err (!%p1813_p12)
}
 0x61d   : > { %1656 = dma.vmem_to_hbm [thread:$0]  (%p1998_p5), %s1554_s27, 128, %s1551_s18, %s1539_s30  }
 0x61e PF: > { %p1662_p13 = scmp.ge.s32.totalorder %s1851_s16, 2  ;;  %s1565_s20 = sand.u32 1, %s1839_s13  }
 0x61f   : > { %s1566_s29 = scalar_lea.sflag [#allocation5], %s1565_s20 }
 0x620   : > { %p1659_p0 = pnand %p1662_p13, %p2002_p6 }
 0x622   : > { %p1660_p1 = pneg %p1659_p0 }
 0x624   : > { %1834 = dma.done.wait (%p1660_p1), %s1566_s29, 128  }
 0x625   : > { %1836 = vsyncadd (%p1660_p1), %s1566_s29, 4294967168  ;;  %p20_p2 = scmp.ge.s32.totalorder %s1985_s19, 4   ;;  %s2930_s13 = smov %s1843_s14 }
 0x626   : > { %s2931_s14 = smov %s1847_s15  ;;  %s2932_s15 = smov %s1996_s22 }
 0x627   : > { %s2933_s16 = smov %s1985_s19  ;;  %22 = sbr.rel (!%p20_p2) target bundleno = 5 (0x5), region = 95 }
 0x62c   :  { %1571 = vsyncpa [#allocation5], 1 }
 0x62d   :  { %1573 = vsyncpa [#allocation5 + $0x1], 1 }

</bundles_post_ra>
